<compile_context>
chip_gen: v7x
topology: tpu7x:2x2x1
jax: 0.10.0
libtpu: 0.0.40
codegen_flags: <defaults>
</compile_context>

<pallas_src>
import functools

import jax
import jax.numpy as jnp
from jax.experimental import pallas as pl
from jax.experimental.pallas import tpu as pltpu

HIDDEN = 480  # fixed by the module definition (padded to 512 in prepare_params)


def _round_up(x, m):
    return (x + m - 1) // m * m


def _pad2(a, rows, cols):
    r, c = a.shape
    return jnp.pad(a, ((0, rows - r), (0, cols - c)))


# ----------------------------------------------------------------------------
# Kernel: fused 4-layer MLP forward for one batch tile.
# All (padded, bf16) weights are VMEM-resident via constant-index BlockSpecs.
# ----------------------------------------------------------------------------
def _mlp_kernel(z_ref, w1_ref, b1_ref, w2_ref, b2_ref, w3_ref, b3_ref,
                wc_ref, bc_ref, o_ref):
    x = z_ref[...].astype(jnp.bfloat16)  # f32 -> bf16 cast in-kernel (no HBM copy)

    h = jnp.dot(x, w1_ref[...], preferred_element_type=jnp.float32) + b1_ref[...]
    h = jnp.maximum(h, 0.0).astype(jnp.bfloat16)   # ReLU (dropout = identity, eval)

    h = jnp.dot(h, w2_ref[...], preferred_element_type=jnp.float32) + b2_ref[...]
    h = jnp.maximum(h, 0.0).astype(jnp.bfloat16)

    h = jnp.dot(h, w3_ref[...], preferred_element_type=jnp.float32) + b3_ref[...]
    h = jnp.maximum(h, 0.0).astype(jnp.bfloat16)

    out = jnp.dot(h, wc_ref[...], preferred_element_type=jnp.float32) + bc_ref[...]
    o_ref[...] = out.astype(o_ref.dtype)


# ----------------------------------------------------------------------------
# One-time parameter preparation (pad + bf16 cast, cached by the caller).
# Zero padding is numerically exact through ReLU and the final matmul.
# ----------------------------------------------------------------------------
def prepare_params(params):
    E = params["w1"].shape[0]
    C = params["wc"].shape[1]
    H_pad = _round_up(HIDDEN, 128)  # 480 -> 512
    C_pad = _round_up(C, 128)       # lane-dense output slab
    return dict(
        w1=_pad2(params["w1"], E, H_pad).astype(jnp.bfloat16),      # K stays = E
        b1=_pad2(params["b1"], 1, H_pad).astype(jnp.float32),
        w2=_pad2(params["w2"], H_pad, H_pad).astype(jnp.bfloat16),
        b2=_pad2(params["b2"], 1, H_pad).astype(jnp.float32),
        w3=_pad2(params["w3"], H_pad, H_pad).astype(jnp.bfloat16),
        b3=_pad2(params["b3"], 1, H_pad).astype(jnp.float32),
        wc=_pad2(params["wc"], H_pad, C_pad).astype(jnp.bfloat16),
        bc=_pad2(params["bc"], 1, C_pad).astype(jnp.float32),
    )


def _choose_block_b(B, block_b):
    """Batch tile: multiple of 128 (<= block_b) minimizing padding waste, with
    >= 2 grid tiles when the batch allows it (v7x megacore); tiny batches use a
    single minimal tile (multiple of 8)."""
    B8 = _round_up(B, 8)
    if B8 <= 128:
        return B8, B8
    want_two_tiles = _round_up(B8, 128) >= 256
    best = None
    for bb in range(128, max(block_b, 128) + 1, 128):
        B_pad = _round_up(B8, bb)
        n_tiles = B_pad // bb
        cost = (1 if (want_two_tiles and n_tiles < 2) else 0,  # keep both TCs busy
                B_pad - B8,                                     # padding waste
                -bb)                                            # prefer bigger tile
        if best is None or cost < best[0]:
            best = (cost, bb, B_pad)
    return best[1], best[2]


# ----------------------------------------------------------------------------
# Forward wrapper.
# ----------------------------------------------------------------------------
@functools.partial(jax.jit, static_argnames=("class_dim", "block_b", "out_dtype"))
def mlp_forward(z, prepped, *, class_dim, block_b=512, out_dtype=jnp.float32):
    """z: [B, embed_dim] f32.  prepped: output of prepare_params.
    Returns [B, class_dim] in out_dtype (f32 default, matching the module)."""
    B, E = z.shape
    H_pad = prepped["w2"].shape[0]
    C_pad = prepped["wc"].shape[1]
    assert prepped["w1"].shape[0] == E, "prepared params do not match embed_dim"

    bb, B_pad = _choose_block_b(B, block_b)
    grid = (B_pad // bb,)

    # Only batch rows are padded (feature dim E stays untouched -> no bf16 copy).
    z_p = z if B_pad == B else jnp.pad(z, ((0, B_pad - B), (0, 0)))

    z_spec = pl.BlockSpec((bb, E), lambda i: (i, 0))
    out_spec = pl.BlockSpec((bb, C_pad), lambda i: (i, 0))

    def const_spec(shape):
        # Constant (0, 0) block: fetched once, resident across all batch tiles.
        # Single-buffer it (double-buffering a constant block is pure VMEM waste).
        idx = lambda i: (0, 0)
        try:
            return pl.BlockSpec(shape, idx, pipeline_mode=pl.Buffered(1))
        except Exception:  # older pallas without pipeline_mode support
            return pl.BlockSpec(shape, idx)

    order = ("w1", "b1", "w2", "b2", "w3", "b3", "wc", "bc")
    in_specs = [z_spec] + [const_spec(prepped[k].shape) for k in order]

    out_itemsize = jnp.dtype(out_dtype).itemsize
    weight_bytes = sum(prepped[k].size * prepped[k].dtype.itemsize for k in order)

    # Advisory cost for XLA's scheduler around the custom call.
    flops = 2 * B_pad * (E * H_pad + 2 * H_pad * H_pad + H_pad * C_pad)
    bytes_accessed = B_pad * E * 4 + weight_bytes + B_pad * C_pad * out_itemsize
    cost = pl.CostEstimate(flops=flops, transcendentals=0,
                           bytes_accessed=bytes_accessed)

    # VMEM budget: single-buffered weights + double-buffered z/out tiles +
    # f32 intermediates, with headroom; clamped to sane scoped limits.
    vmem_est = int(weight_bytes
                   + 2 * bb * E * 4
                   + 2 * bb * C_pad * out_itemsize
                   + 4 * bb * H_pad * 4)
    vmem_limit = min(max(int(vmem_est * 1.25), 32 << 20), 64 << 20)

    out_p = pl.pallas_call(
        _mlp_kernel,
        out_shape=jax.ShapeDtypeStruct((B_pad, C_pad), out_dtype),
        grid_spec=pltpu.PrefetchScalarGridSpec(
            num_scalar_prefetch=0,
            grid=grid,
            in_specs=in_specs,
            out_specs=out_spec,
        ),
        compiler_params=pltpu.CompilerParams(
            dimension_semantics=("parallel",),
            vmem_limit_bytes=vmem_limit,
        ),
        cost_estimate=cost,
    )(z_p, *(prepped[k] for k in order))

    return out_p[:B, :class_dim]


# ----------------------------------------------------------------------------
# Init + pure-JAX reference.
# ----------------------------------------------------------------------------
def init_params(key, embed_dim, class_dim):
    """nn.Linear-style init: U(-1/sqrt(fan_in), 1/sqrt(fan_in)).
    Weights stored [in, out]; biases [1, out]."""
    def linear(key, fan_in, fan_out):
        kw, kb = jax.random.split(key)
        bound = 1.0 / jnp.sqrt(fan_in)
        w = jax.random.uniform(kw, (fan_in, fan_out), jnp.float32, -bound, bound)
        b = jax.random.uniform(kb, (1, fan_out), jnp.float32, -bound, bound)
        return w, b

    k1, k2, k3, kc = jax.random.split(key, 4)
    w1, b1 = linear(k1, embed_dim, HIDDEN)
    w2, b2 = linear(k2, HIDDEN, HIDDEN)
    w3, b3 = linear(k3, HIDDEN, HIDDEN)
    wc, bc = linear(kc, HIDDEN, class_dim)
    return dict(w1=w1, b1=b1, w2=w2, b2=b2, w3=w3, b3=b3, wc=wc, bc=bc)


def mlp_forward_ref(z, p, compute_dtype=jnp.float32):
    def lin(x, w, b):
        return jnp.dot(x.astype(compute_dtype), w.astype(compute_dtype),
                       preferred_element_type=jnp.float32) + b
    h = jax.nn.relu(lin(z, p["w1"], p["b1"]))
    h = jax.nn.relu(lin(h, p["w2"], p["b2"]))
    h = jax.nn.relu(lin(h, p["w3"], p["b3"]))
    return lin(h, p["wc"], p["bc"])


if __name__ == "__main__":
    EMBED_DIM, CLASS_DIM = 32, 16

    key = jax.random.PRNGKey(0)
    kz, kp, kz2 = jax.random.split(key, 3)

    params = init_params(kp, EMBED_DIM, CLASS_DIM)
    prepped = prepare_params(params)   # one-time pad + bf16 cast (cached)

    # --- small batch (single minimal tile) -----------------------------------
    B = 8
    z = jax.random.normal(kz, (B, EMBED_DIM), jnp.float32)
    out = jax.block_until_ready(mlp_forward(z, prepped, class_dim=CLASS_DIM))
    assert out.shape == (B, CLASS_DIM)

    ref_bf16 = mlp_forward_ref(z, params, compute_dtype=jnp.bfloat16)
    assert jnp.allclose(out, ref_bf16, atol=1e-2, rtol=1e-2), "mismatch vs bf16 ref"
    ref_f32 = mlp_forward_ref(z, params, compute_dtype=jnp.float32)
    assert jnp.allclose(out, ref_f32, atol=5e-2, rtol=5e-2), "mismatch vs f32 ref"

    # --- larger batch (exercises row padding + multi-tile 'parallel' grid) ---
    B2 = 300
    z2 = jax.random.normal(kz2, (B2, EMBED_DIM), jnp.float32)
    out2 = jax.block_until_ready(mlp_forward(z2, prepped, class_dim=CLASS_DIM))
    assert out2.shape == (B2, CLASS_DIM)
    ref2 = mlp_forward_ref(z2, params, compute_dtype=jnp.bfloat16)
    assert jnp.allclose(out2, ref2, atol=1e-2, rtol=1e-2), "mismatch vs bf16 ref (B=300)"

    print("KERNEL_OK")
</pallas_src>

<mosaic_0001>
module attributes {stable_mosaic.version = 11 : i64} {
  func.func @_mlp_kernel(%arg0: i32, %arg1: memref<8x32xf32, #tpu.memory_space<vmem>>, %arg2: memref<32x512xbf16, #tpu.memory_space<vmem>>, %arg3: memref<1x512xf32, #tpu.memory_space<vmem>>, %arg4: memref<512x512xbf16, #tpu.memory_space<vmem>>, %arg5: memref<1x512xf32, #tpu.memory_space<vmem>>, %arg6: memref<512x512xbf16, #tpu.memory_space<vmem>>, %arg7: memref<1x512xf32, #tpu.memory_space<vmem>>, %arg8: memref<512x128xbf16, #tpu.memory_space<vmem>>, %arg9: memref<1x128xf32, #tpu.memory_space<vmem>>, %arg10: memref<8x128xf32, #tpu.memory_space<vmem>>) attributes {dimension_semantics = [#tpu.dimension_semantics<parallel>], iteration_bounds = array<i64: 1>, scalar_prefetch = 0 : i64, scratch_operands = 0 : i64, tpu.core_type = #tpu.core_type<tc>, window_params = [{transform_indices = @transform_0, window_bounds = array<i64: 8, 32>}, {pipeline_mode = #tpu.pipeline_mode<synchronous>, transform_indices = @transform_1, window_bounds = array<i64: 32, 512>}, {pipeline_mode = #tpu.pipeline_mode<synchronous>, transform_indices = @transform_2, window_bounds = array<i64: 1, 512>}, {pipeline_mode = #tpu.pipeline_mode<synchronous>, transform_indices = @transform_3, window_bounds = array<i64: 512, 512>}, {pipeline_mode = #tpu.pipeline_mode<synchronous>, transform_indices = @transform_4, window_bounds = array<i64: 1, 512>}, {pipeline_mode = #tpu.pipeline_mode<synchronous>, transform_indices = @transform_5, window_bounds = array<i64: 512, 512>}, {pipeline_mode = #tpu.pipeline_mode<synchronous>, transform_indices = @transform_6, window_bounds = array<i64: 1, 512>}, {pipeline_mode = #tpu.pipeline_mode<synchronous>, transform_indices = @transform_7, window_bounds = array<i64: 512, 128>}, {pipeline_mode = #tpu.pipeline_mode<synchronous>, transform_indices = @transform_8, window_bounds = array<i64: 1, 128>}, {transform_indices = @transform_9, window_bounds = array<i64: 8, 128>}]} {
    %c0 = arith.constant 0 : index
    %c0_0 = arith.constant 0 : index
    %0 = vector.load %arg1[%c0, %c0_0] : memref<8x32xf32, #tpu.memory_space<vmem>>, vector<8x32xf32>
    %1 = arith.truncf %0 : vector<8x32xf32> to vector<8x32xbf16>
    %c0_1 = arith.constant 0 : index
    %c0_2 = arith.constant 0 : index
    %2 = vector.load %arg2[%c0_1, %c0_2] : memref<32x512xbf16, #tpu.memory_space<vmem>>, vector<32x512xbf16>
    %cst = arith.constant dense<0.000000e+00> : vector<8x512xf32>
    %3 = tpu.matmul %1, %2, %cst {dimension_numbers = #tpu.dot_dimension_numbers<[1], [0], [0], [1], [0, 0, 1, 1], [], []>} : vector<8x32xbf16>, vector<32x512xbf16>, vector<8x512xf32> -> vector<8x512xf32>
    %c0_3 = arith.constant 0 : index
    %c0_4 = arith.constant 0 : index
    %4 = vector.load %arg3[%c0_3, %c0_4] : memref<1x512xf32, #tpu.memory_space<vmem>>, vector<1x512xf32>
    %5 = vector.broadcast %4 : vector<1x512xf32> to vector<8x512xf32>
    %6 = arith.addf %3, %5 : vector<8x512xf32>
    %cst_5 = arith.constant 0.000000e+00 : f32
    %7 = vector.broadcast %cst_5 : f32 to vector<8x512xf32>
    %8 = arith.maximumf %6, %7 : vector<8x512xf32>
    %9 = arith.truncf %8 : vector<8x512xf32> to vector<8x512xbf16>
    %c0_6 = arith.constant 0 : index
    %c0_7 = arith.constant 0 : index
    %10 = vector.load %arg4[%c0_6, %c0_7] : memref<512x512xbf16, #tpu.memory_space<vmem>>, vector<512x512xbf16>
    %cst_8 = arith.constant dense<0.000000e+00> : vector<8x512xf32>
    %11 = tpu.matmul %9, %10, %cst_8 {dimension_numbers = #tpu.dot_dimension_numbers<[1], [0], [0], [1], [0, 0, 1, 1], [], []>} : vector<8x512xbf16>, vector<512x512xbf16>, vector<8x512xf32> -> vector<8x512xf32>
    %c0_9 = arith.constant 0 : index
    %c0_10 = arith.constant 0 : index
    %12 = vector.load %arg5[%c0_9, %c0_10] : memref<1x512xf32, #tpu.memory_space<vmem>>, vector<1x512xf32>
    %13 = vector.broadcast %12 : vector<1x512xf32> to vector<8x512xf32>
    %14 = arith.addf %11, %13 : vector<8x512xf32>
    %cst_11 = arith.constant 0.000000e+00 : f32
    %15 = vector.broadcast %cst_11 : f32 to vector<8x512xf32>
    %16 = arith.maximumf %14, %15 : vector<8x512xf32>
    %17 = arith.truncf %16 : vector<8x512xf32> to vector<8x512xbf16>
    %c0_12 = arith.constant 0 : index
    %c0_13 = arith.constant 0 : index
    %18 = vector.load %arg6[%c0_12, %c0_13] : memref<512x512xbf16, #tpu.memory_space<vmem>>, vector<512x512xbf16>
    %cst_14 = arith.constant dense<0.000000e+00> : vector<8x512xf32>
    %19 = tpu.matmul %17, %18, %cst_14 {dimension_numbers = #tpu.dot_dimension_numbers<[1], [0], [0], [1], [0, 0, 1, 1], [], []>} : vector<8x512xbf16>, vector<512x512xbf16>, vector<8x512xf32> -> vector<8x512xf32>
    %c0_15 = arith.constant 0 : index
    %c0_16 = arith.constant 0 : index
    %20 = vector.load %arg7[%c0_15, %c0_16] : memref<1x512xf32, #tpu.memory_space<vmem>>, vector<1x512xf32>
    %21 = vector.broadcast %20 : vector<1x512xf32> to vector<8x512xf32>
    %22 = arith.addf %19, %21 : vector<8x512xf32>
    %cst_17 = arith.constant 0.000000e+00 : f32
    %23 = vector.broadcast %cst_17 : f32 to vector<8x512xf32>
    %24 = arith.maximumf %22, %23 : vector<8x512xf32>
    %25 = arith.truncf %24 : vector<8x512xf32> to vector<8x512xbf16>
    %c0_18 = arith.constant 0 : index
    %c0_19 = arith.constant 0 : index
    %26 = vector.load %arg8[%c0_18, %c0_19] : memref<512x128xbf16, #tpu.memory_space<vmem>>, vector<512x128xbf16>
    %cst_20 = arith.constant dense<0.000000e+00> : vector<8x128xf32>
    %27 = tpu.matmul %25, %26, %cst_20 {dimension_numbers = #tpu.dot_dimension_numbers<[1], [0], [0], [1], [0, 0, 1, 1], [], []>} : vector<8x512xbf16>, vector<512x128xbf16>, vector<8x128xf32> -> vector<8x128xf32>
    %c0_21 = arith.constant 0 : index
    %c0_22 = arith.constant 0 : index
    %28 = vector.load %arg9[%c0_21, %c0_22] : memref<1x128xf32, #tpu.memory_space<vmem>>, vector<1x128xf32>
    %29 = vector.broadcast %28 : vector<1x128xf32> to vector<8x128xf32>
    %30 = arith.addf %27, %29 : vector<8x128xf32>
    %c0_23 = arith.constant 0 : index
    %c0_24 = arith.constant 0 : index
    %31 = vector.load %arg10[%c0_23, %c0_24] : memref<8x128xf32, #tpu.memory_space<vmem>>, vector<8x128xf32>
    tpu.vector_store %arg10[%c0_23, %c0_24], %30 {strides = array<i32>} : memref<8x128xf32, #tpu.memory_space<vmem>>, vector<8x128xf32>,
    return
  }
  func.func @transform_0(%arg0: i32) -> (i32, i32) {
    %c0_i32 = arith.constant 0 : i32
    %c0_i32_0 = arith.constant 0 : i32
    return %arg0, %c0_i32 : i32, i32
  }
  func.func @transform_1(%arg0: i32) -> (i32, i32) {
    %c0_i32 = arith.constant 0 : i32
    %c0_i32_0 = arith.constant 0 : i32
    %c0_i32_1 = arith.constant 0 : i32
    return %c0_i32, %c0_i32_0 : i32, i32
  }
  func.func @transform_2(%arg0: i32) -> (i32, i32) {
    %c0_i32 = arith.constant 0 : i32
    %c0_i32_0 = arith.constant 0 : i32
    %c0_i32_1 = arith.constant 0 : i32
    return %c0_i32, %c0_i32_0 : i32, i32
  }
  func.func @transform_3(%arg0: i32) -> (i32, i32) {
    %c0_i32 = arith.constant 0 : i32
    %c0_i32_0 = arith.constant 0 : i32
    %c0_i32_1 = arith.constant 0 : i32
    return %c0_i32, %c0_i32_0 : i32, i32
  }
  func.func @transform_4(%arg0: i32) -> (i32, i32) {
    %c0_i32 = arith.constant 0 : i32
    %c0_i32_0 = arith.constant 0 : i32
    %c0_i32_1 = arith.constant 0 : i32
    return %c0_i32, %c0_i32_0 : i32, i32
  }
  func.func @transform_5(%arg0: i32) -> (i32, i32) {
    %c0_i32 = arith.constant 0 : i32
    %c0_i32_0 = arith.constant 0 : i32
    %c0_i32_1 = arith.constant 0 : i32
    return %c0_i32, %c0_i32_0 : i32, i32
  }
  func.func @transform_6(%arg0: i32) -> (i32, i32) {
    %c0_i32 = arith.constant 0 : i32
    %c0_i32_0 = arith.constant 0 : i32
    %c0_i32_1 = arith.constant 0 : i32
    return %c0_i32, %c0_i32_0 : i32, i32
  }
  func.func @transform_7(%arg0: i32) -> (i32, i32) {
    %c0_i32 = arith.constant 0 : i32
    %c0_i32_0 = arith.constant 0 : i32
    %c0_i32_1 = arith.constant 0 : i32
    return %c0_i32, %c0_i32_0 : i32, i32
  }
  func.func @transform_8(%arg0: i32) -> (i32, i32) {
    %c0_i32 = arith.constant 0 : i32
    %c0_i32_0 = arith.constant 0 : i32
    %c0_i32_1 = arith.constant 0 : i32
    return %c0_i32, %c0_i32_0 : i32, i32
  }
  func.func @transform_9(%arg0: i32) -> (i32, i32) {
    %c0_i32 = arith.constant 0 : i32
    %c0_i32_0 = arith.constant 0 : i32
    return %arg0, %c0_i32 : i32, i32
  }
}

</mosaic_0001>

<bundles_post_ra>
// kernel: mlp_forward.1
= control target key start
LH: loop header
LB: loop body
LE: loop exit
PB: predicated region body
PF: predicated region fallthrough
CT: control target
= control target key end

     0   :  { %14 = vsyncpa [#allocation3], 0  ;;  %s3743_s0 = inlined_call_operand.hbm [shape: f32[8,32], index: 0, kind: input, shape index: {}]   ;;  %s3744_s1 = inlined_call_operand.hbm [shape: bf16[32,512], index: 1, kind: input, shape index: {}]   ;;  %s3745_s2 = inlined_call_operand.hbm [shape: f32[1,512], index: 2, kind: input, shape index: {}]   ;;  %s3746_s3 = inlined_call_operand.hbm [shape: bf16[512,512], index: 3, kind: input, shape index: {}]   ;;  %s3747_s4 = inlined_call_operand.vmem [shape: f32[1,512], index: 4, kind: input, shape index: {}]   ;;  %s3748_s5 = inlined_call_operand.hbm [shape: bf16[512,512], index: 5, kind: input, shape index: {}]   ;;  %s3749_s6 = inlined_call_operand.vmem [shape: f32[1,512], index: 6, kind: input, shape index: {}]   ;;  %s3750_s7 = inlined_call_operand.hbm [shape: bf16[512,128], index: 7, kind: input, shape index: {}]   ;;  %s3751_s8 = inlined_call_operand.vmem [shape: f32[1,128], index: 8, kind: input, shape index: {}]   ;;  %s3752_s9 = inlined_call_operand.hbm [shape: f32[8,128], index: 9, kind: output, shape index: {}]  }
   0x1   :  { %15 = vsyncpa [#allocation6], 0 }
   0x2   :  { %16 = vsyncpa [#allocation9], 0 }
   0x3   :  { %17 = vsyncpa [#allocation12], 0 }
   0x4   :  { %18 = vsyncpa [#allocation4], 0  ;;  %s3535_s30 = smov [#allocation5]   ;;  %s3371_s13 = scalar_lea.hbm %s3744_s1, 1024 }
   0x5   :  { %s34_s10 = sshll.u32 %s3535_s30, 4  ;;  %p3372_p0 = scmp.ne.s32.totalorder %s3744_s1, %s3371_s13  ;;  %s35_s10 = int_to_ptr.vmem [resolvable:$true] %s34_s10 }
   0x6   :  { %p3375_p1 = scmp.lt.u32.totalorder %s3371_s13, %s3744_s1 }
   0x8   :  { %p3377_p2 = pnand %p3375_p1, %p3372_p0 }
   0xa   :  { %3380 = shalt.err (!%p3377_p2)
}
   0xb   :  { %s3381_s18 = scalar_lea.vmem %s35_s10, 1024  ;;  %p3386_p4 = scmp.lt.s32.totalorder %s35_s10, %s35_s10 }
   0xc   :  { %p3382_p3 = scmp.ne.s32.totalorder %s35_s10, %s3381_s18  ;;  %p3387_p5 = scmp.lt.s32.totalorder %s3381_s18, %s3381_s18 }
   0xe   :  { %p3388_p6 = por %p3387_p5, %p3386_p4 }
  0x10   :  { %p3389_p7 = pnand %p3388_p6, %p3382_p3 }
  0x12   :  { %3392 = shalt.err (!%p3389_p7)
}
  0x13   :  { %s3536_s19 = smov 256   ;;  %s3537_s20 = smov 16  }
  0x14   :  { %40 = dma.hbm_to_vmem [thread:$0]  %s3744_s1, 1024, %s35_s10, [#allocation6], %s3536_s19, %s3536_s19, %s3537_s20  }
  0x15   :  { %s3538_s23 = smov [#allocation8]   ;;  %s3539_s25 = smov [#allocation2]  }
  0x16   :  { %s56_s24 = sshll.u32 %s3538_s23, 4  ;;  %s25_s26 = sshll.u32 %s3539_s25, 4  ;;  %s57_s24 = int_to_ptr.vmem [resolvable:$true] %s56_s24  ;;  %s26_s26 = int_to_ptr.vmem [resolvable:$true] %s25_s26 }
  0x17   :  { %s3393_s29 = scalar_lea.hbm %s3746_s3, 16384 }
  0x18   :  { %p3394_p8 = scmp.ne.s32.totalorder %s3746_s3, %s3393_s29  ;;  %p3397_p9 = scmp.lt.u32.totalorder %s3393_s29, %s3746_s3 }
  0x1a   :  { %p3399_p10 = pnand %p3397_p9, %p3394_p8 }
  0x1c   :  { %3402 = shalt.err (!%p3399_p10)
}
  0x1d   :  { %s3403_s1 = scalar_lea.vmem %s57_s24, 16384  ;;  %p3408_p12 = scmp.lt.s32.totalorder %s57_s24, %s57_s24 }
  0x1e   :  { %p3404_p11 = scmp.ne.s32.totalorder %s57_s24, %s3403_s1  ;;  %p3409_p13 = scmp.lt.s32.totalorder %s3403_s1, %s3403_s1 }
  0x20   :  { %p3410_p0 = por %p3409_p13, %p3408_p12 }
  0x22   :  { %p3411_p1 = pnand %p3410_p0, %p3404_p11 }
  0x24   :  { %3414 = shalt.err (!%p3411_p1)
}
  0x25   :  { %62 = dma.hbm_to_vmem [thread:$0]  %s3746_s3, 16384, %s57_s24, [#allocation9], %s3536_s19, %s3536_s19, %s3537_s20  }
  0x26   :  { %s3415_s17 = scalar_lea.hbm %s3743_s0, 128 }
  0x27   :  { %p3416_p2 = scmp.ne.s32.totalorder %s3743_s0, %s3415_s17  ;;  %p3419_p3 = scmp.lt.u32.totalorder %s3415_s17, %s3743_s0 }
  0x29   :  { %p3421_p4 = pnand %p3419_p3, %p3416_p2 }
  0x2b   :  { %3424 = shalt.err (!%p3421_p4)
}
  0x2c   :  { %s3425_s25 = scalar_lea.vmem %s26_s26, 128  ;;  %p3430_p6 = scmp.lt.s32.totalorder %s26_s26, %s26_s26 }
  0x2d   :  { %p3426_p5 = scmp.ne.s32.totalorder %s26_s26, %s3425_s25  ;;  %p3431_p7 = scmp.lt.s32.totalorder %s3425_s25, %s3425_s25 }
  0x2f   :  { %p3432_p8 = por %p3431_p7, %p3430_p6 }
  0x31   :  { %p3433_p9 = pnand %p3432_p8, %p3426_p5 }
  0x33   :  { %3436 = shalt.err (!%p3433_p9)
}
  0x34   :  { %28 = dma.hbm_to_vmem [thread:$0]  %s3743_s0, 128, %s26_s26, [#allocation3]  }
  0x35   :  { %s3540_s27 = smov [#allocation7]   ;;  %s3541_s29 = smov [#allocation10]  }
  0x36   :  { %s47_s28 = sshll.u32 %s3540_s27, 4  ;;  %s70_s30 = sshll.u32 %s3541_s29, 4  ;;  %s48_s28 = int_to_ptr.vmem [resolvable:$true] %s47_s28  ;;  %s71_s30 = int_to_ptr.vmem [resolvable:$true] %s70_s30 }
  0x37   :  { %s3437_s13 = scalar_lea.hbm %s3745_s2, 64 }
  0x38   :  { %p3438_p10 = scmp.ne.s32.totalorder %s3745_s2, %s3437_s13  ;;  %p3441_p11 = scmp.lt.u32.totalorder %s3437_s13, %s3745_s2 }
  0x3a   :  { %p3443_p12 = pnand %p3441_p11, %p3438_p10 }
  0x3c   :  { %3446 = shalt.err (!%p3443_p12)
}
  0x3d   :  { %s3447_s0 = scalar_lea.vmem %s48_s28, 64  ;;  %p3452_p0 = scmp.lt.s32.totalorder %s48_s28, %s48_s28 }
  0x3e   :  { %p3448_p13 = scmp.ne.s32.totalorder %s48_s28, %s3447_s0  ;;  %p3453_p1 = scmp.lt.s32.totalorder %s3447_s0, %s3447_s0 }
  0x40   :  { %p3454_p2 = por %p3453_p1, %p3452_p0 }
  0x42   :  { %p3455_p3 = pnand %p3454_p2, %p3448_p13 }
  0x44   :  { %3458 = shalt.err (!%p3455_p3)
}
  0x45   :  { %50 = dma.hbm_to_vmem [thread:$0]  %s3745_s2, 64, %s48_s28, [#allocation6]  }
  0x46   :  { %s3459_s21 = scalar_lea.hbm %s3748_s5, 16384 }
  0x47   :  { %p3460_p4 = scmp.ne.s32.totalorder %s3748_s5, %s3459_s21  ;;  %p3463_p5 = scmp.lt.u32.totalorder %s3459_s21, %s3748_s5 }
  0x49   :  { %p3465_p6 = pnand %p3463_p5, %p3460_p4 }
  0x4b   :  { %3468 = shalt.err (!%p3465_p6)
}
  0x4c   :  { %s3469_s24 = scalar_lea.vmem %s71_s30, 16384  ;;  %p3474_p8 = scmp.lt.s32.totalorder %s71_s30, %s71_s30 }
  0x4d   :  { %p3470_p7 = scmp.ne.s32.totalorder %s71_s30, %s3469_s24  ;;  %p3475_p9 = scmp.lt.s32.totalorder %s3469_s24, %s3469_s24 }
  0x4f   :  { %p3476_p10 = por %p3475_p9, %p3474_p8 }
  0x51   :  { %p3477_p11 = pnand %p3476_p10, %p3470_p7 }
  0x53   :  { %3480 = shalt.err (!%p3477_p11)
}
  0x54   :  { %76 = dma.hbm_to_vmem [thread:$0]  %s3748_s5, 16384, %s71_s30, [#allocation9], %s3536_s19, %s3536_s19, %s3537_s20  }
  0x55   :  { %s3542_s28 = smov [#allocation11]   ;;  %s3481_s13 = scalar_lea.hbm %s3750_s7, 4096 }
  0x56   :  { %s84_s29 = sshll.u32 %s3542_s28, 4  ;;  %p3482_p12 = scmp.ne.s32.totalorder %s3750_s7, %s3481_s13  ;;  %s85_s29 = int_to_ptr.vmem [resolvable:$true] %s84_s29 }
  0x57   :  { %p3485_p13 = scmp.lt.u32.totalorder %s3481_s13, %s3750_s7 }
  0x59   :  { %p3487_p0 = pnand %p3485_p13, %p3482_p12 }
  0x5b   :  { %3490 = shalt.err (!%p3487_p0)
}
  0x5c   :  { %s3491_s0 = scalar_lea.vmem %s85_s29, 4096  ;;  %p3496_p2 = scmp.lt.s32.totalorder %s85_s29, %s85_s29 }
  0x5d   :  { %p3492_p1 = scmp.ne.s32.totalorder %s85_s29, %s3491_s0  ;;  %p3497_p3 = scmp.lt.s32.totalorder %s3491_s0, %s3491_s0 }
  0x5f   :  { %p3498_p4 = por %p3497_p3, %p3496_p2 }
  0x61   :  { %p3499_p5 = pnand %p3498_p4, %p3492_p1 }
  0x63   :  { %3502 = shalt.err (!%p3499_p5)
}
  0x64   :  { %s3543_s5 = smov 64   ;;  %s3544_s19 = smov 4  }
  0x65   :  { %90 = dma.hbm_to_vmem [thread:$0]  %s3750_s7, 4096, %s85_s29, [#allocation12], %s3543_s5, %s3543_s5, %s3544_s19  }
  0x66   :  { %3525 = dma.done.wait [#allocation3], 128  }
  0x67   :  { %3526 = vsyncadd [#allocation3], 4294967168 }
  0x68   :  { %3527 = dma.done.wait [#allocation6], 1088  }
  0x69   :  { %3528 = vsyncadd [#allocation6], 4294966208 }
  0x6a   :  { %3529 = dma.done.wait [#allocation9], 32768  }
  0x6b   :  { %3530 = vsyncadd [#allocation9], 4294934528 }
  0x6c   :  { %3531 = dma.done.wait [#allocation12], 4096  }
  0x6d   :  { %3532 = vsyncadd [#allocation12], 4294963200  ;;  %v3545_v0 = vmov 0   ;;  %v2943_v1 = vld [vmem:[#allocation5 + $0x4] ss:$16 sps:$4 sm:$0xff]   ;;  %v112_v5 = vld [vmem:[#allocation2] sm:$0xff] }
  0x6e   :  { %220 = vmatprep.mubr.bf16.mxu0 %v3545_v0  ;;  %261 = vmatprep.mubr.bf16.mxu1 %v3545_v0  ;;  %v2945_v2 = vld [vmem:[#allocation5] ss:$16 sps:$4 sm:$0xff]   ;;  %v2946_v3 = vld [vmem:[#allocation5 + $0x24] ss:$16 sps:$4 sm:$0xff]   ;;  %v2949_v6 = vld [vmem:[#allocation5 + $0xc] ss:$16 sps:$4 sm:$0xff]   ;;  %v113_v9 = vpack.c.bf16 %v112_v5, %v112_v5 }
  0x6f   :  { %188 = vmatprep.subr.bf16.mxu0 %v2943_v1  ;;  %v2948_v4 = vld [vmem:[#allocation5 + $0x20] ss:$16 sps:$4 sm:$0xff]   ;;  %v2951_v7 = vld [vmem:[#allocation5 + $0x8] ss:$16 sps:$4 sm:$0xff]   ;;  %229 = vmatprep.subr.bf16.mxu1 %v2949_v6  ;;  %v2952_v8 = vld [vmem:[#allocation5 + $0x2c] ss:$16 sps:$4 sm:$0xff]  }
  0x70   :  { %189 = vmatpush1.bf16.msra.mxu0 %v2945_v2  ;;  %230 = vmatpush1.bf16.msra.mxu1 %v2951_v7  ;;  %v2954_v10 = vld [vmem:[#allocation5 + $0x28] ss:$16 sps:$4 sm:$0xff]   ;;  %vm184_vm0 = vcmask 261120   ;;  %v2955_v12 = vld [vmem:[#allocation8] ss:$16 sps:$4 sm:$0xff]   ;;  %s3546_s18 = smov [#allocation13]  }
  0x71   :  { %190 = vmatprep.subr.bf16.mxu0 %v2946_v3  ;;  %v2957_v11 = vld [vmem:[#allocation8 + $0x4] ss:$16 sps:$4 sm:$0xff]   ;;  %231 = vmatprep.subr.bf16.mxu1 %v2952_v8  ;;  %v2960_v13 = vld [vmem:[#allocation8 + $0xc] ss:$16 sps:$4 sm:$0xff]   ;;  %v2958_v15 = vld [vmem:[#allocation8 + $0x8] ss:$16 sps:$4 sm:$0xff]  }
  0x72   :  { %v2963_v14 = vld [vmem:[#allocation8 + $0x24] ss:$16 sps:$4 sm:$0xff]   ;;  %v2961_v16 = vld [vmem:[#allocation8 + $0x20] ss:$16 sps:$4 sm:$0xff]   ;;  %v2966_v17 = vld [vmem:[#allocation8 + $0x2c] ss:$16 sps:$4 sm:$0xff]  }
  0x73   :  { %v2969_v18 = vld [vmem:[#allocation8 + $0x44] ss:$16 sps:$4 sm:$0xff]   ;;  %v2964_v19 = vld [vmem:[#allocation8 + $0x28] ss:$16 sps:$4 sm:$0xff]   ;;  %v2967_v20 = vld [vmem:[#allocation8 + $0x40] ss:$16 sps:$4 sm:$0xff]  }
  0x74   :  { %191 = vmatpush1.bf16.msra.mxu0 %v2948_v4  ;;  %232 = vmatpush1.bf16.msra.mxu1 %v2954_v10  ;;  %v2972_v21 = vld [vmem:[#allocation8 + $0x4c] ss:$16 sps:$4 sm:$0xff]   ;;  %v2975_v22 = vld [vmem:[#allocation8 + $0x64] ss:$16 sps:$4 sm:$0xff]   ;;  %v2970_v23 = vld [vmem:[#allocation8 + $0x48] ss:$16 sps:$4 sm:$0xff]  }
  0x75   :  { %1068 = vmatprep.subr.bf16.mxu0 %v2957_v11  ;;  %1150 = vmatprep.subr.bf16.mxu1 %v2960_v13  ;;  %v2973_v24 = vld [vmem:[#allocation8 + $0x60] ss:$16 sps:$4 sm:$0xff]   ;;  %v2978_v25 = vld [vmem:[#allocation8 + $0x6c] ss:$16 sps:$4 sm:$0xff]   ;;  %v2981_v26 = vld [vmem:[#allocation8 + $0x84] ss:$16 sps:$4 sm:$0xff]   ;;  %v124_v13 = vlaneseq }
  0x76   :  { %v2976_v27 = vld [vmem:[#allocation8 + $0x68] ss:$16 sps:$4 sm:$0xff]   ;;  %v2979_v28 = vld [vmem:[#allocation8 + $0x80] ss:$16 sps:$4 sm:$0xff]   ;;  %v2984_v29 = vld [vmem:[#allocation8 + $0x8c] ss:$16 sps:$4 sm:$0xff]  }
  0x77   :  { %2572 = vmatmul.mubr.msk.bf16.vlgmr.msra.gmra.mrb[0].mxu0 %vm184_vm0, %v113_v9  ;;  %2573 = vmatmul.mubr.msk.bf16.vlgmr.msra.gmra.mrb[0].mxu1 %vm184_vm0, %v113_v9  ;;  %v2987_v30 = vld [vmem:[#allocation8 + $0xa4] ss:$16 sps:$4 sm:$0xff]   ;;  %v2982_v31 = vld [vmem:[#allocation8 + $0x88] ss:$16 sps:$4 sm:$0xff]   ;;  %v2985_v32 = vld [vmem:[#allocation8 + $0xa0] ss:$16 sps:$4 sm:$0xff]  }
  0x78   :  { %1069 = vmatpush1.bf16.msra.mxu0 %v2955_v12  ;;  %1151 = vmatpush1.bf16.msra.mxu1 %v2958_v15  ;;  %v2990_v33 = vld [vmem:[#allocation8 + $0xac] ss:$16 sps:$4 sm:$0xff]   ;;  %v2993_v34 = vld [vmem:[#allocation8 + $0xc4] ss:$16 sps:$4 sm:$0xff]   ;;  %v2988_v35 = vld [vmem:[#allocation8 + $0xa8] ss:$16 sps:$4 sm:$0xff]  }
  0x79   :  { %1070 = vmatprep.subr.bf16.mxu0 %v2963_v14  ;;  %1152 = vmatprep.subr.bf16.mxu1 %v2966_v17  ;;  %v2991_v36 = vld [vmem:[#allocation8 + $0xc0] ss:$16 sps:$4 sm:$0xff]   ;;  %v2996_v37 = vld [vmem:[#allocation8 + $0xcc] ss:$16 sps:$4 sm:$0xff]   ;;  %v2999_v38 = vld [vmem:[#allocation8 + $0xe4] ss:$16 sps:$4 sm:$0xff]  }
  0x7a   :  { %v2994_v39 = vld [vmem:[#allocation8 + $0xc8] ss:$16 sps:$4 sm:$0xff]   ;;  %v2997_v40 = vld [vmem:[#allocation8 + $0xe0] ss:$16 sps:$4 sm:$0xff]   ;;  %v3002_v41 = vld [vmem:[#allocation8 + $0xec] ss:$16 sps:$4 sm:$0xff]  }
  0x7b   :  { %v3005_v42 = vld [vmem:[#allocation8 + $0x104] ss:$16 sps:$4 sm:$0xff]   ;;  %v3000_v43 = vld [vmem:[#allocation8 + $0xe8] ss:$16 sps:$4 sm:$0xff]   ;;  %v3003_v44 = vld [vmem:[#allocation8 + $0x100] ss:$16 sps:$4 sm:$0xff]  }
  0x7c   :  { %1071 = vmatpush1.bf16.msra.mxu0 %v2961_v16  ;;  %1153 = vmatpush1.bf16.msra.mxu1 %v2964_v19  ;;  %v3008_v45 = vld [vmem:[#allocation8 + $0x10c] ss:$16 sps:$4 sm:$0xff]   ;;  %v3011_v46 = vld [vmem:[#allocation8 + $0x124] ss:$16 sps:$4 sm:$0xff]   ;;  %v3006_v47 = vld [vmem:[#allocation8 + $0x108] ss:$16 sps:$4 sm:$0xff]  }
  0x7d   :  { %1072 = vmatprep.subr.bf16.mxu0 %v2969_v18  ;;  %1154 = vmatprep.subr.bf16.mxu1 %v2972_v21  ;;  %v3009_v48 = vld [vmem:[#allocation8 + $0x120] ss:$16 sps:$4 sm:$0xff]   ;;  %v3014_v49 = vld [vmem:[#allocation8 + $0x12c] ss:$16 sps:$4 sm:$0xff]   ;;  %v3017_v50 = vld [vmem:[#allocation8 + $0x144] ss:$16 sps:$4 sm:$0xff]  }
  0x7e   :  { %v3012_v51 = vld [vmem:[#allocation8 + $0x128] ss:$16 sps:$4 sm:$0xff]   ;;  %v3015_v52 = vld [vmem:[#allocation8 + $0x140] ss:$16 sps:$4 sm:$0xff]   ;;  %v3020_v53 = vld [vmem:[#allocation8 + $0x14c] ss:$16 sps:$4 sm:$0xff]  }
  0x7f   :  { %v3023_v54 = vld [vmem:[#allocation8 + $0x164] ss:$16 sps:$4 sm:$0xff]   ;;  %v3018_v55 = vld [vmem:[#allocation8 + $0x148] ss:$16 sps:$4 sm:$0xff]   ;;  %v3021_v56 = vld [vmem:[#allocation8 + $0x160] ss:$16 sps:$4 sm:$0xff]  }
  0x80   :  { %1073 = vmatpush1.bf16.msra.mxu0 %v2967_v20  ;;  %1155 = vmatpush1.bf16.msra.mxu1 %v2970_v23  ;;  %v3026_v57 = vld [vmem:[#allocation8 + $0x16c] ss:$16 sps:$4 sm:$0xff]   ;;  %v3029_v58 = vld [vmem:[#allocation8 + $0x184] ss:$16 sps:$4 sm:$0xff]   ;;  %v3024_v59 = vld [vmem:[#allocation8 + $0x168] ss:$16 sps:$4 sm:$0xff]  }
  0x81   :  { %1074 = vmatprep.subr.bf16.mxu0 %v2975_v22  ;;  %1156 = vmatprep.subr.bf16.mxu1 %v2978_v25  ;;  %v3027_v60 = vld [vmem:[#allocation8 + $0x180] ss:$16 sps:$4 sm:$0xff]   ;;  %v3032_v61 = vld [vmem:[#allocation8 + $0x18c] ss:$16 sps:$4 sm:$0xff]   ;;  %v3035_v62 = vld [vmem:[#allocation8 + $0x1a4] ss:$16 sps:$4 sm:$0xff]  }
  0x82   :  { %v3030_v63 = vld [vmem:[#allocation8 + $0x188] ss:$16 sps:$4 sm:$0xff]   ;;  %v3033_v0 = vld [vmem:[#allocation8 + $0x1a0] ss:$16 sps:$4 sm:$0xff]   ;;  %v3038_v1 = vld [vmem:[#allocation8 + $0x1ac] ss:$16 sps:$4 sm:$0xff]  }
  0x83   :  { %v3036_v2 = vld [vmem:[#allocation8 + $0x1a8] ss:$16 sps:$4 sm:$0xff]   ;;  %v3041_v3 = vld [vmem:[#allocation8 + $0x1c4] ss:$16 sps:$4 sm:$0xff]   ;;  %v3044_v4 = vld [vmem:[#allocation8 + $0x1cc] ss:$16 sps:$4 sm:$0xff]  }
  0x84   :  { %1075 = vmatpush1.bf16.msra.mxu0 %v2973_v24  ;;  %1157 = vmatpush1.bf16.msra.mxu1 %v2976_v27  ;;  %v3039_v5 = vld [vmem:[#allocation8 + $0x1c0] ss:$16 sps:$4 sm:$0xff]   ;;  %v3042_v6 = vld [vmem:[#allocation8 + $0x1c8] ss:$16 sps:$4 sm:$0xff]   ;;  %v3047_v7 = vld [vmem:[#allocation8 + $0x1e4] ss:$16 sps:$4 sm:$0xff]  }
  0x85   :  { %1076 = vmatprep.subr.bf16.mxu0 %v2981_v26  ;;  %1158 = vmatprep.subr.bf16.mxu1 %v2984_v29  ;;  %v3050_v8 = vld [vmem:[#allocation8 + $0x1ec] ss:$16 sps:$4 sm:$0xff]   ;;  %v3045_v9 = vld [vmem:[#allocation8 + $0x1e0] ss:$16 sps:$4 sm:$0xff]   ;;  %v3048_v10 = vld [vmem:[#allocation8 + $0x1e8] ss:$16 sps:$4 sm:$0xff]  }
  0x86   :  { %v3053_v11 = vld [vmem:[#allocation8 + $0x204] ss:$16 sps:$4 sm:$0xff]   ;;  %v3056_v12 = vld [vmem:[#allocation8 + $0x20c] ss:$16 sps:$4 sm:$0xff]   ;;  %v3678_v14 = vshrl.u32 %v124_v13, 7  ;;  %s2552_s21 = sshll.u32 %s3546_s18, 4  ;;  %s2553_s21 = int_to_ptr.vmem [resolvable:$true] %s2552_s21 }
  0x87   :  { %v3683_v16 = vld [vmem:[#allocation7] sm:$0xf]  ;;  %v3113_v13 = vld [vmem:[#allocation8 + $0x344] ss:$16 sps:$4 sm:$0xff]   ;;  %s3503_s22 = scalar_lea.vmem %s2553_s21, 128  ;;  %p3508_p7 = scmp.lt.s32.totalorder %s2553_s21, %s2553_s21 }
  0x88   :  { %1077 = vmatpush1.bf16.msra.mxu0 %v2979_v28  ;;  %1159 = vmatpush1.bf16.msra.mxu1 %v2982_v31  ;;  %v3681_v15 = vsub.s32 0, %v3678_v14  ;;  %v3686_v17 = vsub.s32 1, %v3678_v14  ;;  %v3691_v19 = vsub.s32 3, %v3678_v14  ;;  %p3504_p6 = scmp.ne.s32.totalorder %s2553_s21, %s3503_s22  ;;  %p3509_p8 = scmp.lt.s32.totalorder %s3503_s22, %s3503_s22 }
  0x89   :  { %1078 = vmatprep.subr.bf16.mxu0 %v2987_v30  ;;  %1160 = vmatprep.subr.bf16.mxu1 %v2990_v33 }
  0x8a   :  { %v127_v18 = vrot.slane %v3683_v16, %v3681_v15  ;;  %v131_v20 = vrot.slane %v3683_v16, %v3686_v17  ;;  %v139_v24 = vrot.slane %v3683_v16, %v3691_v19  ;;  %p3510_p9 = por %p3509_p8, %p3508_p7 }
  0x8c   :  { %1079 = vmatpush1.bf16.msra.mxu0 %v2985_v32  ;;  %1161 = vmatpush1.bf16.msra.mxu1 %v2988_v35  ;;  %v3051_v35 = vld [vmem:[#allocation8 + $0x200] ss:$16 sps:$4 sm:$0xff]   ;;  %p3511_p10 = pnand %p3510_p9, %p3504_p6 }
  0x8d   :  { %1080 = vmatprep.subr.bf16.mxu0 %v2993_v34  ;;  %1162 = vmatprep.subr.bf16.mxu1 %v2996_v37 }
  0x90   :  { %1081 = vmatpush1.bf16.msra.mxu0 %v2991_v36  ;;  %1163 = vmatpush1.bf16.msra.mxu1 %v2994_v39  ;;  %v3054_v36 = vld [vmem:[#allocation8 + $0x208] ss:$16 sps:$4 sm:$0xff]   ;;  %v3059_v39 = vld [vmem:[#allocation8 + $0x224] ss:$16 sps:$4 sm:$0xff]  }
  0x91   :  { %1082 = vmatprep.subr.bf16.mxu0 %v2999_v38  ;;  %1164 = vmatprep.subr.bf16.mxu1 %v3002_v41 }
  0x94   :  { %1083 = vmatpush1.bf16.msra.mxu0 %v2997_v40  ;;  %1165 = vmatpush1.bf16.msra.mxu1 %v3000_v43  ;;  %v3062_v40 = vld [vmem:[#allocation8 + $0x22c] ss:$16 sps:$4 sm:$0xff]   ;;  %v3057_v43 = vld [vmem:[#allocation8 + $0x220] ss:$16 sps:$4 sm:$0xff]  }
  0x95   :  { %1084 = vmatprep.subr.bf16.mxu0 %v3005_v42  ;;  %1166 = vmatprep.subr.bf16.mxu1 %v3008_v45  ;;  %v3065_v45 = vld [vmem:[#allocation8 + $0x244] ss:$16 sps:$4 sm:$0xff]  }
  0x98   :  { %1085 = vmatpush1.bf16.msra.mxu0 %v3003_v44  ;;  %1167 = vmatpush1.bf16.msra.mxu1 %v3006_v47  ;;  %v3060_v44 = vld [vmem:[#allocation8 + $0x228] ss:$16 sps:$4 sm:$0xff]   ;;  %v3063_v47 = vld [vmem:[#allocation8 + $0x240] ss:$16 sps:$4 sm:$0xff]  }
  0x99   :  { %1086 = vmatprep.subr.bf16.mxu0 %v3011_v46  ;;  %1168 = vmatprep.subr.bf16.mxu1 %v3014_v49  ;;  %v3068_v46 = vld [vmem:[#allocation8 + $0x24c] ss:$16 sps:$4 sm:$0xff]   ;;  %v3071_v49 = vld [vmem:[#allocation8 + $0x264] ss:$16 sps:$4 sm:$0xff]  }
  0x9c   :  { %1087 = vmatpush1.bf16.msra.mxu0 %v3009_v48  ;;  %1169 = vmatpush1.bf16.msra.mxu1 %v3012_v51  ;;  %v3066_v48 = vld [vmem:[#allocation8 + $0x248] ss:$16 sps:$4 sm:$0xff]   ;;  %v3069_v51 = vld [vmem:[#allocation8 + $0x260] ss:$16 sps:$4 sm:$0xff]  }
  0x9d   :  { %1088 = vmatprep.subr.bf16.mxu0 %v3017_v50  ;;  %1170 = vmatprep.subr.bf16.mxu1 %v3020_v53  ;;  %v3074_v50 = vld [vmem:[#allocation8 + $0x26c] ss:$16 sps:$4 sm:$0xff]   ;;  %v3077_v53 = vld [vmem:[#allocation8 + $0x284] ss:$16 sps:$4 sm:$0xff]  }
  0xa0   :  { %1089 = vmatpush1.bf16.msra.mxu0 %v3015_v52  ;;  %1171 = vmatpush1.bf16.msra.mxu1 %v3018_v55  ;;  %v3072_v52 = vld [vmem:[#allocation8 + $0x268] ss:$16 sps:$4 sm:$0xff]   ;;  %v3075_v55 = vld [vmem:[#allocation8 + $0x280] ss:$16 sps:$4 sm:$0xff]  }
  0xa1   :  { %1090 = vmatprep.subr.bf16.mxu0 %v3023_v54  ;;  %1172 = vmatprep.subr.bf16.mxu1 %v3026_v57  ;;  %v3080_v54 = vld [vmem:[#allocation8 + $0x28c] ss:$16 sps:$4 sm:$0xff]   ;;  %v3083_v57 = vld [vmem:[#allocation8 + $0x2a4] ss:$16 sps:$4 sm:$0xff]  }
  0xa4   :  { %1091 = vmatpush1.bf16.msra.mxu0 %v3021_v56  ;;  %1173 = vmatpush1.bf16.msra.mxu1 %v3024_v59  ;;  %v3078_v56 = vld [vmem:[#allocation8 + $0x288] ss:$16 sps:$4 sm:$0xff]   ;;  %v3081_v59 = vld [vmem:[#allocation8 + $0x2a0] ss:$16 sps:$4 sm:$0xff]  }
  0xa5   :  { %1092 = vmatprep.subr.bf16.mxu0 %v3029_v58  ;;  %1174 = vmatprep.subr.bf16.mxu1 %v3032_v61  ;;  %v3086_v58 = vld [vmem:[#allocation8 + $0x2ac] ss:$16 sps:$4 sm:$0xff]   ;;  %v3089_v61 = vld [vmem:[#allocation8 + $0x2c4] ss:$16 sps:$4 sm:$0xff]  }
  0xa8   :  { %1093 = vmatpush1.bf16.msra.mxu0 %v3027_v60  ;;  %1175 = vmatpush1.bf16.msra.mxu1 %v3030_v63  ;;  %v3084_v60 = vld [vmem:[#allocation8 + $0x2a8] ss:$16 sps:$4 sm:$0xff]   ;;  %v3087_v63 = vld [vmem:[#allocation8 + $0x2c0] ss:$16 sps:$4 sm:$0xff]  }
  0xa9   :  { %1094 = vmatprep.subr.bf16.mxu0 %v3035_v62  ;;  %1176 = vmatprep.subr.bf16.mxu1 %v3038_v1  ;;  %v3092_v62 = vld [vmem:[#allocation8 + $0x2cc] ss:$16 sps:$4 sm:$0xff]   ;;  %v3095_v1 = vld [vmem:[#allocation8 + $0x2e4] ss:$16 sps:$4 sm:$0xff]  }
  0xac   :  { %1095 = vmatpush1.bf16.msra.mxu0 %v3033_v0  ;;  %1177 = vmatpush1.bf16.msra.mxu1 %v3036_v2  ;;  %v3090_v0 = vld [vmem:[#allocation8 + $0x2c8] ss:$16 sps:$4 sm:$0xff]   ;;  %v3098_v2 = vld [vmem:[#allocation8 + $0x2ec] ss:$16 sps:$4 sm:$0xff]  }
  0xad   :  { %1096 = vmatprep.subr.bf16.mxu0 %v3041_v3  ;;  %1178 = vmatprep.subr.bf16.mxu1 %v3044_v4  ;;  %v3093_v3 = vld [vmem:[#allocation8 + $0x2e0] ss:$16 sps:$4 sm:$0xff]   ;;  %v3096_v4 = vld [vmem:[#allocation8 + $0x2e8] ss:$16 sps:$4 sm:$0xff]  }
  0xb0   :  { %1097 = vmatpush1.bf16.msra.mxu0 %v3039_v5  ;;  %1179 = vmatpush1.bf16.msra.mxu1 %v3042_v6  ;;  %v3101_v5 = vld [vmem:[#allocation8 + $0x304] ss:$16 sps:$4 sm:$0xff]   ;;  %v3104_v6 = vld [vmem:[#allocation8 + $0x30c] ss:$16 sps:$4 sm:$0xff]  }
  0xb1   :  { %1098 = vmatprep.subr.bf16.mxu0 %v3047_v7  ;;  %1180 = vmatprep.subr.bf16.mxu1 %v3050_v8  ;;  %v3099_v7 = vld [vmem:[#allocation8 + $0x300] ss:$16 sps:$4 sm:$0xff]   ;;  %v3102_v8 = vld [vmem:[#allocation8 + $0x308] ss:$16 sps:$4 sm:$0xff]  }
  0xb4   :  { %1099 = vmatpush1.bf16.msra.mxu0 %v3045_v9  ;;  %1181 = vmatpush1.bf16.msra.mxu1 %v3048_v10  ;;  %v3107_v9 = vld [vmem:[#allocation8 + $0x324] ss:$16 sps:$4 sm:$0xff]   ;;  %v3110_v10 = vld [vmem:[#allocation8 + $0x32c] ss:$16 sps:$4 sm:$0xff]  }
  0xb5   :  { %1109 = vmatprep.subr.bf16.mxu0 %v3053_v11  ;;  %1191 = vmatprep.subr.bf16.mxu1 %v3056_v12  ;;  %v3105_v11 = vld [vmem:[#allocation8 + $0x320] ss:$16 sps:$4 sm:$0xff]   ;;  %v3108_v12 = vld [vmem:[#allocation8 + $0x328] ss:$16 sps:$4 sm:$0xff]  }
 0x14a   :  { %v222_v21 = vpop.f32.mrb[0].mxu0  ;;  %v3697_v29 = vpop.f32.mrb[0].mxu1 }
 0x14b   :  { %v223_v22 = vadd.f32 %v222_v21, %v127_v18  ;;  %v224_v23 = vpop.f32.mrb[1].mxu0  ;;  %v265_v31 = vpop.f32.mrb[1].mxu1  ;;  %v3116_v18 = vld [vmem:[#allocation8 + $0x34c] ss:$16 sps:$4 sm:$0xff]   ;;  %v3114_v21 = vld [vmem:[#allocation8 + $0x348] ss:$16 sps:$4 sm:$0xff]  }
 0x14c   :  { %v225_v25 = vadd.f32 %v224_v23, %v131_v20  ;;  %v226_v26 = vpop.f32.mrb[2].mxu0  ;;  %v266_v32 = vadd.f32 %v265_v31, %v139_v24  ;;  %v267_v33 = vpop.f32.mrb[2].mxu1  ;;  %v3111_v20 = vld [vmem:[#allocation8 + $0x340] ss:$16 sps:$4 sm:$0xff]   ;;  %v3122_v23 = vld [vmem:[#allocation8 + $0x36c] ss:$16 sps:$4 sm:$0xff]  }
 0x14d   :  { %v270_v27 = vmax.f32 %v223_v22, 0.0  ;;  %v227_v28 = vpop.f32.mrb[3].mxu0  ;;  %v268_v37 = vpop.f32.mrb[3].mxu1  ;;  %v3119_v22 = vld [vmem:[#allocation8 + $0x364] ss:$16 sps:$4 sm:$0xff]   ;;  %v3700_v31 = vsub.s32 2, %v3678_v14 }
 0x14e   :  { %v271_v30 = vmax.f32 %v225_v25, 0.0  ;;  %v273_v41 = vmax.f32 %v266_v32, 0.0  ;;  %v3117_v24 = vld [vmem:[#allocation8 + $0x360] ss:$16 sps:$4 sm:$0xff]   ;;  %v3120_v25 = vld [vmem:[#allocation8 + $0x368] ss:$16 sps:$4 sm:$0xff]  }
 0x14f   :  { %v274_v38 = vpack.c.bf16 %v270_v27, %v270_v27  ;;  %v3125_v26 = vld [vmem:[#allocation8 + $0x384] ss:$16 sps:$4 sm:$0xff]   ;;  %v3128_v27 = vld [vmem:[#allocation8 + $0x38c] ss:$16 sps:$4 sm:$0xff]   ;;  %v3123_v28 = vld [vmem:[#allocation8 + $0x380] ss:$16 sps:$4 sm:$0xff]  }
 0x150   :  { %v275_v34 = vpack.c.bf16 %v271_v30, %v271_v30  ;;  %v277_v42 = vpack.c.bf16 %v273_v41, %v273_v41  ;;  %v3126_v30 = vld [vmem:[#allocation8 + $0x388] ss:$16 sps:$4 sm:$0xff]   ;;  %v3131_v32 = vld [vmem:[#allocation8 + $0x3a4] ss:$16 sps:$4 sm:$0xff]   ;;  %v3134_v33 = vld [vmem:[#allocation8 + $0x3ac] ss:$16 sps:$4 sm:$0xff]  }
 0x151   :  { %v3137_v37 = vld [vmem:[#allocation8 + $0x3c4] ss:$16 sps:$4 sm:$0xff]  }
 0x152   :  { %1100 = vmatprep.mubr.bf16.mxu0 %v275_v34  ;;  %1182 = vmatprep.mubr.bf16.mxu1 %v275_v34  ;;  %v3129_v34 = vld [vmem:[#allocation8 + $0x3a0] ss:$16 sps:$4 sm:$0xff]   ;;  %v3143_v41 = vld [vmem:[#allocation8 + $0x3e4] ss:$16 sps:$4 sm:$0xff]  }
 0x153   :  { %1101 = vmatmul.mubr.bf16.vlgmr.msra.gmra.mrb[4].mxu0 %v274_v38  ;;  %1183 = vmatmul.mubr.bf16.vlgmr.msra.gmra.mrb[4].mxu1 %v274_v38  ;;  %v3140_v38 = vld [vmem:[#allocation8 + $0x3cc] ss:$16 sps:$4 sm:$0xff]  }
 0x154   :  { %1110 = vmatpush1.bf16.msra.mxu0 %v3051_v35  ;;  %1192 = vmatpush1.bf16.msra.mxu1 %v3054_v36  ;;  %v3132_v35 = vld [vmem:[#allocation8 + $0x3a8] ss:$16 sps:$4 sm:$0xff]   ;;  %v135_v36 = vrot.slane %v3683_v16, %v3700_v31  ;;  %v3149_v16 = vld [vmem:[#allocation10 + $0x4] ss:$16 sps:$4 sm:$0xff]  }
 0x155   :  { %1111 = vmatprep.subr.bf16.mxu0 %v3059_v39  ;;  %1193 = vmatprep.subr.bf16.mxu1 %v3062_v40  ;;  %v3135_v39 = vld [vmem:[#allocation8 + $0x3c0] ss:$16 sps:$4 sm:$0xff]   ;;  %v3138_v40 = vld [vmem:[#allocation8 + $0x3c8] ss:$16 sps:$4 sm:$0xff]  }
 0x156   :  { %1141 = vmatprep.mubr.bf16.mxu0 %v277_v42  ;;  %1223 = vmatprep.mubr.bf16.mxu1 %v277_v42  ;;  %v264_v14 = vadd.f32 %v3697_v29, %v135_v36  ;;  %v3146_v42 = vld [vmem:[#allocation8 + $0x3ec] ss:$16 sps:$4 sm:$0xff]   ;;  %v3155_v29 = vld [vmem:[#allocation10 + $0x24] ss:$16 sps:$4 sm:$0xff]  }
 0x157   :  { %v3221_v36 = vld [vmem:[#allocation10 + $0x184] ss:$16 sps:$4 sm:$0xff]  }
 0x158   :  { %1112 = vmatpush1.bf16.msra.mxu0 %v3057_v43  ;;  %1194 = vmatpush1.bf16.msra.mxu1 %v3060_v44  ;;  %v3141_v43 = vld [vmem:[#allocation8 + $0x3e0] ss:$16 sps:$4 sm:$0xff]   ;;  %v3144_v44 = vld [vmem:[#allocation8 + $0x3e8] ss:$16 sps:$4 sm:$0xff]  }
 0x159   :  { %1113 = vmatprep.subr.bf16.mxu0 %v3065_v45  ;;  %1195 = vmatprep.subr.bf16.mxu1 %v3068_v46  ;;  %v272_v45 = vmax.f32 %v264_v14, 0.0  ;;  %v3152_v46 = vld [vmem:[#allocation10 + $0xc] ss:$16 sps:$4 sm:$0xff]  }
 0x15a   :  { %v3230_v14 = vld [vmem:[#allocation10 + $0x1ac] ss:$16 sps:$4 sm:$0xff]  }
 0x15c   :  { %1114 = vmatpush1.bf16.msra.mxu0 %v3063_v47  ;;  %1196 = vmatpush1.bf16.msra.mxu1 %v3066_v48  ;;  %v3147_v47 = vld [vmem:[#allocation10] ss:$16 sps:$4 sm:$0xff]   ;;  %v3150_v48 = vld [vmem:[#allocation10 + $0x8] ss:$16 sps:$4 sm:$0xff]  }
 0x15d   :  { %1115 = vmatprep.subr.bf16.mxu0 %v3071_v49  ;;  %1197 = vmatprep.subr.bf16.mxu1 %v3074_v50  ;;  %v276_v49 = vpack.c.bf16 %v272_v45, %v272_v45  ;;  %v3158_v50 = vld [vmem:[#allocation10 + $0x2c] ss:$16 sps:$4 sm:$0xff]   ;;  %v3231_v45 = vld [vmem:[#allocation10 + $0x1c0] ss:$16 sps:$4 sm:$0xff]  }
 0x160   :  { %1116 = vmatpush1.bf16.msra.mxu0 %v3069_v51  ;;  %1198 = vmatpush1.bf16.msra.mxu1 %v3072_v52  ;;  %v3153_v51 = vld [vmem:[#allocation10 + $0x20] ss:$16 sps:$4 sm:$0xff]   ;;  %v3156_v52 = vld [vmem:[#allocation10 + $0x28] ss:$16 sps:$4 sm:$0xff]  }
 0x161   :  { %1117 = vmatprep.subr.bf16.mxu0 %v3077_v53  ;;  %1199 = vmatprep.subr.bf16.mxu1 %v3080_v54  ;;  %v3161_v53 = vld [vmem:[#allocation10 + $0x44] ss:$16 sps:$4 sm:$0xff]   ;;  %v3164_v54 = vld [vmem:[#allocation10 + $0x4c] ss:$16 sps:$4 sm:$0xff]  }
 0x164   :  { %1118 = vmatpush1.bf16.msra.mxu0 %v3075_v55  ;;  %1200 = vmatpush1.bf16.msra.mxu1 %v3078_v56  ;;  %v3159_v55 = vld [vmem:[#allocation10 + $0x40] ss:$16 sps:$4 sm:$0xff]   ;;  %v3162_v56 = vld [vmem:[#allocation10 + $0x48] ss:$16 sps:$4 sm:$0xff]  }
 0x165   :  { %1119 = vmatprep.subr.bf16.mxu0 %v3083_v57  ;;  %1201 = vmatprep.subr.bf16.mxu1 %v3086_v58  ;;  %v3167_v57 = vld [vmem:[#allocation10 + $0x64] ss:$16 sps:$4 sm:$0xff]   ;;  %v3170_v58 = vld [vmem:[#allocation10 + $0x6c] ss:$16 sps:$4 sm:$0xff]  }
 0x168   :  { %1120 = vmatpush1.bf16.msra.mxu0 %v3081_v59  ;;  %1202 = vmatpush1.bf16.msra.mxu1 %v3084_v60  ;;  %v3165_v59 = vld [vmem:[#allocation10 + $0x60] ss:$16 sps:$4 sm:$0xff]   ;;  %v3168_v60 = vld [vmem:[#allocation10 + $0x68] ss:$16 sps:$4 sm:$0xff]  }
 0x169   :  { %1121 = vmatprep.subr.bf16.mxu0 %v3089_v61  ;;  %1203 = vmatprep.subr.bf16.mxu1 %v3092_v62  ;;  %v3173_v61 = vld [vmem:[#allocation10 + $0x84] ss:$16 sps:$4 sm:$0xff]   ;;  %v3176_v62 = vld [vmem:[#allocation10 + $0x8c] ss:$16 sps:$4 sm:$0xff]  }
 0x16c   :  { %1122 = vmatpush1.bf16.msra.mxu0 %v3087_v63  ;;  %1204 = vmatpush1.bf16.msra.mxu1 %v3090_v0  ;;  %v3171_v63 = vld [vmem:[#allocation10 + $0x80] ss:$16 sps:$4 sm:$0xff]   ;;  %v3174_v0 = vld [vmem:[#allocation10 + $0x88] ss:$16 sps:$4 sm:$0xff]  }
 0x16d   :  { %1123 = vmatprep.subr.bf16.mxu0 %v3095_v1  ;;  %1205 = vmatprep.subr.bf16.mxu1 %v3098_v2  ;;  %v3179_v1 = vld [vmem:[#allocation10 + $0xa4] ss:$16 sps:$4 sm:$0xff]   ;;  %v3182_v2 = vld [vmem:[#allocation10 + $0xac] ss:$16 sps:$4 sm:$0xff]  }
 0x170   :  { %1124 = vmatpush1.bf16.msra.mxu0 %v3093_v3  ;;  %1206 = vmatpush1.bf16.msra.mxu1 %v3096_v4  ;;  %v3177_v3 = vld [vmem:[#allocation10 + $0xa0] ss:$16 sps:$4 sm:$0xff]   ;;  %v3180_v4 = vld [vmem:[#allocation10 + $0xa8] ss:$16 sps:$4 sm:$0xff]  }
 0x171   :  { %1125 = vmatprep.subr.bf16.mxu0 %v3101_v5  ;;  %1207 = vmatprep.subr.bf16.mxu1 %v3104_v6  ;;  %v3185_v5 = vld [vmem:[#allocation10 + $0xc4] ss:$16 sps:$4 sm:$0xff]   ;;  %v3188_v6 = vld [vmem:[#allocation10 + $0xcc] ss:$16 sps:$4 sm:$0xff]  }
 0x174   :  { %1126 = vmatpush1.bf16.msra.mxu0 %v3099_v7  ;;  %1208 = vmatpush1.bf16.msra.mxu1 %v3102_v8  ;;  %v3183_v7 = vld [vmem:[#allocation10 + $0xc0] ss:$16 sps:$4 sm:$0xff]   ;;  %v3186_v8 = vld [vmem:[#allocation10 + $0xc8] ss:$16 sps:$4 sm:$0xff]  }
 0x175   :  { %1127 = vmatprep.subr.bf16.mxu0 %v3107_v9  ;;  %1209 = vmatprep.subr.bf16.mxu1 %v3110_v10  ;;  %v3191_v9 = vld [vmem:[#allocation10 + $0xe4] ss:$16 sps:$4 sm:$0xff]   ;;  %v3194_v10 = vld [vmem:[#allocation10 + $0xec] ss:$16 sps:$4 sm:$0xff]  }
 0x178   :  { %1128 = vmatpush1.bf16.msra.mxu0 %v3105_v11  ;;  %1210 = vmatpush1.bf16.msra.mxu1 %v3108_v12  ;;  %v3189_v11 = vld [vmem:[#allocation10 + $0xe0] ss:$16 sps:$4 sm:$0xff]   ;;  %v3192_v12 = vld [vmem:[#allocation10 + $0xe8] ss:$16 sps:$4 sm:$0xff]  }
 0x179   :  { %1129 = vmatprep.subr.bf16.mxu0 %v3113_v13  ;;  %1211 = vmatprep.subr.bf16.mxu1 %v3116_v18  ;;  %v3197_v13 = vld [vmem:[#allocation10 + $0x104] ss:$16 sps:$4 sm:$0xff]   ;;  %v3200_v18 = vld [vmem:[#allocation10 + $0x10c] ss:$16 sps:$4 sm:$0xff]  }
 0x17c   :  { %1130 = vmatpush1.bf16.msra.mxu0 %v3111_v20  ;;  %1212 = vmatpush1.bf16.msra.mxu1 %v3114_v21  ;;  %v3195_v20 = vld [vmem:[#allocation10 + $0x100] ss:$16 sps:$4 sm:$0xff]   ;;  %v3198_v21 = vld [vmem:[#allocation10 + $0x108] ss:$16 sps:$4 sm:$0xff]  }
 0x17d   :  { %1131 = vmatprep.subr.bf16.mxu0 %v3119_v22  ;;  %1213 = vmatprep.subr.bf16.mxu1 %v3122_v23  ;;  %v3203_v22 = vld [vmem:[#allocation10 + $0x124] ss:$16 sps:$4 sm:$0xff]   ;;  %v3206_v23 = vld [vmem:[#allocation10 + $0x12c] ss:$16 sps:$4 sm:$0xff]  }
 0x180   :  { %1132 = vmatpush1.bf16.msra.mxu0 %v3117_v24  ;;  %1214 = vmatpush1.bf16.msra.mxu1 %v3120_v25  ;;  %v3201_v24 = vld [vmem:[#allocation10 + $0x120] ss:$16 sps:$4 sm:$0xff]   ;;  %v3204_v25 = vld [vmem:[#allocation10 + $0x128] ss:$16 sps:$4 sm:$0xff]  }
 0x181   :  { %1133 = vmatprep.subr.bf16.mxu0 %v3125_v26  ;;  %1215 = vmatprep.subr.bf16.mxu1 %v3128_v27  ;;  %v3209_v26 = vld [vmem:[#allocation10 + $0x144] ss:$16 sps:$4 sm:$0xff]   ;;  %v3212_v27 = vld [vmem:[#allocation10 + $0x14c] ss:$16 sps:$4 sm:$0xff]  }
 0x184   :  { %1134 = vmatpush1.bf16.msra.mxu0 %v3123_v28  ;;  %1216 = vmatpush1.bf16.msra.mxu1 %v3126_v30  ;;  %v3207_v28 = vld [vmem:[#allocation10 + $0x140] ss:$16 sps:$4 sm:$0xff]   ;;  %v3210_v30 = vld [vmem:[#allocation10 + $0x148] ss:$16 sps:$4 sm:$0xff]  }
 0x185   :  { %1135 = vmatprep.subr.bf16.mxu0 %v3131_v32  ;;  %1217 = vmatprep.subr.bf16.mxu1 %v3134_v33  ;;  %v3215_v32 = vld [vmem:[#allocation10 + $0x164] ss:$16 sps:$4 sm:$0xff]   ;;  %v3218_v33 = vld [vmem:[#allocation10 + $0x16c] ss:$16 sps:$4 sm:$0xff]  }
 0x188   :  { %1136 = vmatpush1.bf16.msra.mxu0 %v3129_v34  ;;  %1218 = vmatpush1.bf16.msra.mxu1 %v3132_v35  ;;  %v3213_v34 = vld [vmem:[#allocation10 + $0x160] ss:$16 sps:$4 sm:$0xff]   ;;  %v3216_v35 = vld [vmem:[#allocation10 + $0x168] ss:$16 sps:$4 sm:$0xff]  }
 0x189   :  { %1137 = vmatprep.subr.bf16.mxu0 %v3137_v37  ;;  %1219 = vmatprep.subr.bf16.mxu1 %v3140_v38  ;;  %v3224_v37 = vld [vmem:[#allocation10 + $0x18c] ss:$16 sps:$4 sm:$0xff]   ;;  %v3219_v38 = vld [vmem:[#allocation10 + $0x180] ss:$16 sps:$4 sm:$0xff]  }
 0x18c   :  { %1138 = vmatpush1.bf16.msra.mxu0 %v3135_v39  ;;  %1220 = vmatpush1.bf16.msra.mxu1 %v3138_v40  ;;  %v3222_v39 = vld [vmem:[#allocation10 + $0x188] ss:$16 sps:$4 sm:$0xff]   ;;  %v3227_v40 = vld [vmem:[#allocation10 + $0x1a4] ss:$16 sps:$4 sm:$0xff]  }
 0x18d   :  { %1139 = vmatprep.subr.bf16.mxu0 %v3143_v41  ;;  %1221 = vmatprep.subr.bf16.mxu1 %v3146_v42  ;;  %v3225_v41 = vld [vmem:[#allocation10 + $0x1a0] ss:$16 sps:$4 sm:$0xff]   ;;  %v3228_v42 = vld [vmem:[#allocation10 + $0x1a8] ss:$16 sps:$4 sm:$0xff]  }
 0x190   :  { %1140 = vmatpush1.bf16.msra.mxu0 %v3141_v43  ;;  %1222 = vmatpush1.bf16.msra.mxu1 %v3144_v44  ;;  %v3233_v43 = vld [vmem:[#allocation10 + $0x1c4] ss:$16 sps:$4 sm:$0xff]   ;;  %v3236_v44 = vld [vmem:[#allocation10 + $0x1cc] ss:$16 sps:$4 sm:$0xff]  }
 0x191   :  { %2030 = vmatprep.subr.bf16.mxu0 %v3149_v16  ;;  %2112 = vmatprep.subr.bf16.mxu1 %v3152_v46  ;;  %v3234_v16 = vld [vmem:[#allocation10 + $0x1c8] ss:$16 sps:$4 sm:$0xff]   ;;  %v3239_v46 = vld [vmem:[#allocation10 + $0x1e4] ss:$16 sps:$4 sm:$0xff]  }
 0x193   :  { %1142 = vmatmul.mubr.bf16.vlgmr.msra.gmra.mrb[4].mxu0 %v276_v49  ;;  %1224 = vmatmul.mubr.bf16.vlgmr.msra.gmra.mrb[4].mxu1 %v276_v49  ;;  %v3240_v49 = vld [vmem:[#allocation10 + $0x1e8] ss:$16 sps:$4 sm:$0xff]  }
 0x194   :  { %2031 = vmatpush1.bf16.msra.mxu0 %v3147_v47  ;;  %2113 = vmatpush1.bf16.msra.mxu1 %v3150_v48  ;;  %v3242_v47 = vld [vmem:[#allocation10 + $0x1ec] ss:$16 sps:$4 sm:$0xff]   ;;  %v3237_v48 = vld [vmem:[#allocation10 + $0x1e0] ss:$16 sps:$4 sm:$0xff]  }
 0x195   :  { %2032 = vmatprep.subr.bf16.mxu0 %v3155_v29  ;;  %2114 = vmatprep.subr.bf16.mxu1 %v3158_v50  ;;  %v3245_v29 = vld [vmem:[#allocation10 + $0x204] ss:$16 sps:$4 sm:$0xff]   ;;  %v3248_v50 = vld [vmem:[#allocation10 + $0x20c] ss:$16 sps:$4 sm:$0xff]  }
 0x198   :  { %2033 = vmatpush1.bf16.msra.mxu0 %v3153_v51  ;;  %2115 = vmatpush1.bf16.msra.mxu1 %v3156_v52  ;;  %v3708_v51 = vld [vmem:[%s3747_s4] sm:$0xf] }
 0x199   :  { %2034 = vmatprep.subr.bf16.mxu0 %v3161_v53  ;;  %2116 = vmatprep.subr.bf16.mxu1 %v3164_v54  ;;  %v411_v52 = vrot.slane %v3708_v51, %v3681_v15  ;;  %v415_v53 = vrot.slane %v3708_v51, %v3686_v17  ;;  %v423_v54 = vrot.slane %v3708_v51, %v3691_v19 }
 0x19c   :  { %2035 = vmatpush1.bf16.msra.mxu0 %v3159_v55  ;;  %2117 = vmatpush1.bf16.msra.mxu1 %v3162_v56 }
 0x19d   :  { %2036 = vmatprep.subr.bf16.mxu0 %v3167_v57  ;;  %2118 = vmatprep.subr.bf16.mxu1 %v3170_v58 }
 0x1a0   :  { %2037 = vmatpush1.bf16.msra.mxu0 %v3165_v59  ;;  %2119 = vmatpush1.bf16.msra.mxu1 %v3168_v60 }
 0x1a1   :  { %2038 = vmatprep.subr.bf16.mxu0 %v3173_v61  ;;  %2120 = vmatprep.subr.bf16.mxu1 %v3176_v62 }
 0x1a4   :  { %2039 = vmatpush1.bf16.msra.mxu0 %v3171_v63  ;;  %2121 = vmatpush1.bf16.msra.mxu1 %v3174_v0 }
 0x1a5   :  { %2040 = vmatprep.subr.bf16.mxu0 %v3179_v1  ;;  %2122 = vmatprep.subr.bf16.mxu1 %v3182_v2 }
 0x1a8   :  { %2041 = vmatpush1.bf16.msra.mxu0 %v3177_v3  ;;  %2123 = vmatpush1.bf16.msra.mxu1 %v3180_v4 }
 0x1a9   :  { %2042 = vmatprep.subr.bf16.mxu0 %v3185_v5  ;;  %2124 = vmatprep.subr.bf16.mxu1 %v3188_v6  ;;  %v3243_v6 = vld [vmem:[#allocation10 + $0x200] ss:$16 sps:$4 sm:$0xff]  }
 0x1ac   :  { %2043 = vmatpush1.bf16.msra.mxu0 %v3183_v7  ;;  %2125 = vmatpush1.bf16.msra.mxu1 %v3186_v8  ;;  %v3246_v7 = vld [vmem:[#allocation10 + $0x208] ss:$16 sps:$4 sm:$0xff]  }
 0x1ad   :  { %2044 = vmatprep.subr.bf16.mxu0 %v3191_v9  ;;  %2126 = vmatprep.subr.bf16.mxu1 %v3194_v10  ;;  %v3251_v9 = vld [vmem:[#allocation10 + $0x224] ss:$16 sps:$4 sm:$0xff]   ;;  %v3254_v10 = vld [vmem:[#allocation10 + $0x22c] ss:$16 sps:$4 sm:$0xff]  }
 0x1b0   :  { %2045 = vmatpush1.bf16.msra.mxu0 %v3189_v11  ;;  %2127 = vmatpush1.bf16.msra.mxu1 %v3192_v12  ;;  %v3249_v12 = vld [vmem:[#allocation10 + $0x220] ss:$16 sps:$4 sm:$0xff]  }
 0x1b1   :  { %2046 = vmatprep.subr.bf16.mxu0 %v3197_v13  ;;  %2128 = vmatprep.subr.bf16.mxu1 %v3200_v18  ;;  %v3252_v13 = vld [vmem:[#allocation10 + $0x228] ss:$16 sps:$4 sm:$0xff]   ;;  %v3257_v18 = vld [vmem:[#allocation10 + $0x244] ss:$16 sps:$4 sm:$0xff]  }
 0x1b4   :  { %2047 = vmatpush1.bf16.msra.mxu0 %v3195_v20  ;;  %2129 = vmatpush1.bf16.msra.mxu1 %v3198_v21  ;;  %v3260_v20 = vld [vmem:[#allocation10 + $0x24c] ss:$16 sps:$4 sm:$0xff]   ;;  %v3255_v21 = vld [vmem:[#allocation10 + $0x240] ss:$16 sps:$4 sm:$0xff]  }
 0x1b5   :  { %2048 = vmatprep.subr.bf16.mxu0 %v3203_v22  ;;  %2130 = vmatprep.subr.bf16.mxu1 %v3206_v23  ;;  %v3258_v22 = vld [vmem:[#allocation10 + $0x248] ss:$16 sps:$4 sm:$0xff]   ;;  %v3263_v23 = vld [vmem:[#allocation10 + $0x264] ss:$16 sps:$4 sm:$0xff]  }
 0x1b8   :  { %2049 = vmatpush1.bf16.msra.mxu0 %v3201_v24  ;;  %2131 = vmatpush1.bf16.msra.mxu1 %v3204_v25  ;;  %v3266_v24 = vld [vmem:[#allocation10 + $0x26c] ss:$16 sps:$4 sm:$0xff]   ;;  %v3261_v25 = vld [vmem:[#allocation10 + $0x260] ss:$16 sps:$4 sm:$0xff]  }
 0x1b9   :  { %2050 = vmatprep.subr.bf16.mxu0 %v3209_v26  ;;  %2132 = vmatprep.subr.bf16.mxu1 %v3212_v27  ;;  %v3264_v26 = vld [vmem:[#allocation10 + $0x268] ss:$16 sps:$4 sm:$0xff]   ;;  %v3269_v27 = vld [vmem:[#allocation10 + $0x284] ss:$16 sps:$4 sm:$0xff]  }
 0x1bc   :  { %2051 = vmatpush1.bf16.msra.mxu0 %v3207_v28  ;;  %2133 = vmatpush1.bf16.msra.mxu1 %v3210_v30  ;;  %v3272_v28 = vld [vmem:[#allocation10 + $0x28c] ss:$16 sps:$4 sm:$0xff]   ;;  %v3267_v30 = vld [vmem:[#allocation10 + $0x280] ss:$16 sps:$4 sm:$0xff]  }
 0x1bd   :  { %2052 = vmatprep.subr.bf16.mxu0 %v3215_v32  ;;  %2134 = vmatprep.subr.bf16.mxu1 %v3218_v33  ;;  %v3270_v32 = vld [vmem:[#allocation10 + $0x288] ss:$16 sps:$4 sm:$0xff]   ;;  %v3275_v33 = vld [vmem:[#allocation10 + $0x2a4] ss:$16 sps:$4 sm:$0xff]  }
 0x1c0   :  { %2053 = vmatpush1.bf16.msra.mxu0 %v3213_v34  ;;  %2135 = vmatpush1.bf16.msra.mxu1 %v3216_v35  ;;  %v3278_v34 = vld [vmem:[#allocation10 + $0x2ac] ss:$16 sps:$4 sm:$0xff]   ;;  %v3273_v35 = vld [vmem:[#allocation10 + $0x2a0] ss:$16 sps:$4 sm:$0xff]  }
 0x1c1   :  { %2054 = vmatprep.subr.bf16.mxu0 %v3221_v36  ;;  %2136 = vmatprep.subr.bf16.mxu1 %v3224_v37  ;;  %v3276_v36 = vld [vmem:[#allocation10 + $0x2a8] ss:$16 sps:$4 sm:$0xff]   ;;  %v3281_v37 = vld [vmem:[#allocation10 + $0x2c4] ss:$16 sps:$4 sm:$0xff]  }
 0x1c4   :  { %2055 = vmatpush1.bf16.msra.mxu0 %v3219_v38  ;;  %2137 = vmatpush1.bf16.msra.mxu1 %v3222_v39  ;;  %v3284_v38 = vld [vmem:[#allocation10 + $0x2cc] ss:$16 sps:$4 sm:$0xff]   ;;  %v3279_v39 = vld [vmem:[#allocation10 + $0x2c0] ss:$16 sps:$4 sm:$0xff]  }
 0x1c5   :  { %2056 = vmatprep.subr.bf16.mxu0 %v3227_v40  ;;  %2138 = vmatprep.subr.bf16.mxu1 %v3230_v14  ;;  %v3282_v40 = vld [vmem:[#allocation10 + $0x2c8] ss:$16 sps:$4 sm:$0xff]   ;;  %v3287_v14 = vld [vmem:[#allocation10 + $0x2e4] ss:$16 sps:$4 sm:$0xff]  }
 0x1c8   :  { %2057 = vmatpush1.bf16.msra.mxu0 %v3225_v41  ;;  %2139 = vmatpush1.bf16.msra.mxu1 %v3228_v42  ;;  %v3290_v41 = vld [vmem:[#allocation10 + $0x2ec] ss:$16 sps:$4 sm:$0xff]   ;;  %v3285_v42 = vld [vmem:[#allocation10 + $0x2e0] ss:$16 sps:$4 sm:$0xff]  }
 0x1c9   :  { %2058 = vmatprep.subr.bf16.mxu0 %v3233_v43  ;;  %2140 = vmatprep.subr.bf16.mxu1 %v3236_v44  ;;  %v3288_v43 = vld [vmem:[#allocation10 + $0x2e8] ss:$16 sps:$4 sm:$0xff]   ;;  %v3293_v44 = vld [vmem:[#allocation10 + $0x304] ss:$16 sps:$4 sm:$0xff]  }
 0x1cc   :  { %2059 = vmatpush1.bf16.msra.mxu0 %v3231_v45  ;;  %2141 = vmatpush1.bf16.msra.mxu1 %v3234_v16  ;;  %v3296_v45 = vld [vmem:[#allocation10 + $0x30c] ss:$16 sps:$4 sm:$0xff]   ;;  %v3291_v16 = vld [vmem:[#allocation10 + $0x300] ss:$16 sps:$4 sm:$0xff]  }
 0x1cd   :  { %2060 = vmatprep.subr.bf16.mxu0 %v3239_v46  ;;  %2142 = vmatprep.subr.bf16.mxu1 %v3242_v47  ;;  %v3294_v46 = vld [vmem:[#allocation10 + $0x308] ss:$16 sps:$4 sm:$0xff]   ;;  %v3299_v47 = vld [vmem:[#allocation10 + $0x324] ss:$16 sps:$4 sm:$0xff]  }
 0x1d0   :  { %2061 = vmatpush1.bf16.msra.mxu0 %v3237_v48  ;;  %2143 = vmatpush1.bf16.msra.mxu1 %v3240_v49  ;;  %v3302_v48 = vld [vmem:[#allocation10 + $0x32c] ss:$16 sps:$4 sm:$0xff]   ;;  %v3297_v49 = vld [vmem:[#allocation10 + $0x320] ss:$16 sps:$4 sm:$0xff]  }
 0x1d1   :  { %2071 = vmatprep.subr.bf16.mxu0 %v3245_v29  ;;  %2153 = vmatprep.subr.bf16.mxu1 %v3248_v50  ;;  %v3300_v29 = vld [vmem:[#allocation10 + $0x328] ss:$16 sps:$4 sm:$0xff]   ;;  %v3305_v50 = vld [vmem:[#allocation10 + $0x344] ss:$16 sps:$4 sm:$0xff]  }
 0x266   :  { %v1143_v55 = vpop.f32.mrb[4].mxu0  ;;  %v3716_v56 = vpop.f32.mrb[4].mxu1 }
 0x267   :  { %v2907_v57 = vadd.f32 %v1143_v55, %v411_v52  ;;  %v1145_v58 = vpop.f32.mrb[5].mxu0  ;;  %v1227_v59 = vpop.f32.mrb[5].mxu1  ;;  %v3308_v52 = vld [vmem:[#allocation10 + $0x34c] ss:$16 sps:$4 sm:$0xff]   ;;  %v3311_v55 = vld [vmem:[#allocation10 + $0x364] ss:$16 sps:$4 sm:$0xff]  }
 0x268   :  { %v2908_v60 = vadd.f32 %v1145_v58, %v415_v53  ;;  %v2910_v61 = vadd.f32 %v1227_v59, %v423_v54  ;;  %v1147_v62 = vpop.f32.mrb[6].mxu0  ;;  %v1229_v63 = vpop.f32.mrb[6].mxu1  ;;  %v3303_v53 = vld [vmem:[#allocation10 + $0x340] ss:$16 sps:$4 sm:$0xff]   ;;  %v3306_v54 = vld [vmem:[#allocation10 + $0x348] ss:$16 sps:$4 sm:$0xff]  }
 0x269   :  { %v1232_v0 = vmax.f32 %v2907_v57, 0.0  ;;  %v1148_v1 = vpop.f32.mrb[7].mxu0  ;;  %v1230_v2 = vpop.f32.mrb[7].mxu1  ;;  %v3314_v57 = vld [vmem:[#allocation10 + $0x36c] ss:$16 sps:$4 sm:$0xff]  }
 0x26a   :  { %v1233_v3 = vmax.f32 %v2908_v60, 0.0  ;;  %v1235_v4 = vmax.f32 %v2910_v61, 0.0  ;;  %v3309_v58 = vld [vmem:[#allocation10 + $0x360] ss:$16 sps:$4 sm:$0xff]   ;;  %v3312_v59 = vld [vmem:[#allocation10 + $0x368] ss:$16 sps:$4 sm:$0xff]  }
 0x26b   :  { %v1236_v8 = vpack.c.bf16 %v1232_v0, %v1232_v0  ;;  %v3317_v60 = vld [vmem:[#allocation10 + $0x384] ss:$16 sps:$4 sm:$0xff]   ;;  %v3320_v61 = vld [vmem:[#allocation10 + $0x38c] ss:$16 sps:$4 sm:$0xff]   ;;  %v3315_v62 = vld [vmem:[#allocation10 + $0x380] ss:$16 sps:$4 sm:$0xff]  }
 0x26c   :  { %v1237_v5 = vpack.c.bf16 %v1233_v3, %v1233_v3  ;;  %v1239_v11 = vpack.c.bf16 %v1235_v4, %v1235_v4  ;;  %v3318_v63 = vld [vmem:[#allocation10 + $0x388] ss:$16 sps:$4 sm:$0xff]   ;;  %v3323_v0 = vld [vmem:[#allocation10 + $0x3a4] ss:$16 sps:$4 sm:$0xff]   ;;  %v3326_v1 = vld [vmem:[#allocation10 + $0x3ac] ss:$16 sps:$4 sm:$0xff]   ;;  %v419_v4 = vrot.slane %v3708_v51, %v3700_v31 }
 0x26d   :  { %v3321_v2 = vld [vmem:[#allocation10 + $0x3a0] ss:$16 sps:$4 sm:$0xff]   ;;  %v3324_v3 = vld [vmem:[#allocation10 + $0x3a8] ss:$16 sps:$4 sm:$0xff]  }
 0x26e   :  { %2062 = vmatprep.mubr.bf16.mxu0 %v1237_v5  ;;  %2144 = vmatprep.mubr.bf16.mxu1 %v1237_v5  ;;  %v3329_v5 = vld [vmem:[#allocation10 + $0x3c4] ss:$16 sps:$4 sm:$0xff]  }
 0x26f   :  { %2063 = vmatmul.mubr.bf16.vlgmr.msra.gmra.mrb[8].mxu0 %v1236_v8  ;;  %2145 = vmatmul.mubr.bf16.vlgmr.msra.gmra.mrb[8].mxu1 %v1236_v8  ;;  %v3330_v8 = vld [vmem:[#allocation10 + $0x3c8] ss:$16 sps:$4 sm:$0xff]   ;;  %v3339_v51 = vld [vmem:[#allocation11 + $0x40] sm:$0xff]  }
 0x270   :  { %2072 = vmatpush1.bf16.msra.mxu0 %v3243_v6  ;;  %2154 = vmatpush1.bf16.msra.mxu1 %v3246_v7  ;;  %v3332_v6 = vld [vmem:[#allocation10 + $0x3cc] ss:$16 sps:$4 sm:$0xff]   ;;  %v3327_v7 = vld [vmem:[#allocation10 + $0x3c0] ss:$16 sps:$4 sm:$0xff]  }
 0x271   :  { %2103 = vmatprep.mubr.bf16.mxu0 %v1239_v11  ;;  %2185 = vmatprep.mubr.bf16.mxu1 %v1239_v11  ;;  %v3338_v11 = vld [vmem:[#allocation10 + $0x3ec] ss:$16 sps:$4 sm:$0xff]  }
 0x272   :  { %2073 = vmatprep.subr.bf16.mxu0 %v3251_v9  ;;  %2155 = vmatprep.subr.bf16.mxu1 %v3254_v10  ;;  %v2909_v9 = vadd.f32 %v3716_v56, %v419_v4  ;;  %v3335_v10 = vld [vmem:[#allocation10 + $0x3e4] ss:$16 sps:$4 sm:$0xff]   ;;  %v3343_v56 = vld [vmem:[#allocation11 + $0x48] sm:$0xff]  }
 0x274   :  { %2074 = vmatpush1.bf16.msra.mxu0 %v3249_v12  ;;  %2156 = vmatpush1.bf16.msra.mxu1 %v3252_v13  ;;  %v3333_v12 = vld [vmem:[#allocation10 + $0x3e0] ss:$16 sps:$4 sm:$0xff]   ;;  %v3336_v13 = vld [vmem:[#allocation10 + $0x3e8] ss:$16 sps:$4 sm:$0xff]  }
 0x275   :  { %2075 = vmatprep.subr.bf16.mxu0 %v3257_v18  ;;  %2157 = vmatprep.subr.bf16.mxu1 %v3260_v20  ;;  %v1234_v18 = vmax.f32 %v2909_v9, 0.0  ;;  %v3340_v20 = vld [vmem:[#allocation11 + $0xc0] sm:$0xff]  }
 0x278   :  { %2076 = vmatpush1.bf16.msra.mxu0 %v3255_v21  ;;  %2158 = vmatpush1.bf16.msra.mxu1 %v3258_v22  ;;  %v3341_v21 = vld [vmem:[#allocation11] sm:$0xff]  }
 0x279   :  { %2077 = vmatprep.subr.bf16.mxu0 %v3263_v23  ;;  %2159 = vmatprep.subr.bf16.mxu1 %v3266_v24  ;;  %v3342_v22 = vld [vmem:[#allocation11 + $0x80] sm:$0xff]   ;;  %v1238_v23 = vpack.c.bf16 %v1234_v18, %v1234_v18  ;;  %v3344_v24 = vld [vmem:[#allocation11 + $0xc8] sm:$0xff]  }
 0x27c   :  { %2078 = vmatpush1.bf16.msra.mxu0 %v3261_v25  ;;  %2160 = vmatpush1.bf16.msra.mxu1 %v3264_v26  ;;  %v3345_v25 = vld [vmem:[#allocation11 + $0x8] sm:$0xff]  }
 0x27d   :  { %2079 = vmatprep.subr.bf16.mxu0 %v3269_v27  ;;  %2161 = vmatprep.subr.bf16.mxu1 %v3272_v28  ;;  %v3346_v26 = vld [vmem:[#allocation11 + $0x88] sm:$0xff]   ;;  %v3347_v27 = vld [vmem:[#allocation11 + $0x50] sm:$0xff]  }
 0x27e   :  { %v3348_v28 = vld [vmem:[#allocation11 + $0xd0] sm:$0xff]  }
 0x280   :  { %2080 = vmatpush1.bf16.msra.mxu0 %v3267_v30  ;;  %2162 = vmatpush1.bf16.msra.mxu1 %v3270_v32  ;;  %v3349_v30 = vld [vmem:[#allocation11 + $0x10] sm:$0xff]  }
 0x281   :  { %2081 = vmatprep.subr.bf16.mxu0 %v3275_v33  ;;  %2163 = vmatprep.subr.bf16.mxu1 %v3278_v34  ;;  %v3350_v32 = vld [vmem:[#allocation11 + $0x90] sm:$0xff]   ;;  %v3351_v33 = vld [vmem:[#allocation11 + $0x58] sm:$0xff]  }
 0x282   :  { %v3352_v34 = vld [vmem:[#allocation11 + $0xd8] sm:$0xff]  }
 0x284   :  { %2082 = vmatpush1.bf16.msra.mxu0 %v3273_v35  ;;  %2164 = vmatpush1.bf16.msra.mxu1 %v3276_v36  ;;  %v3353_v35 = vld [vmem:[#allocation11 + $0x18] sm:$0xff]  }
 0x285   :  { %2083 = vmatprep.subr.bf16.mxu0 %v3281_v37  ;;  %2165 = vmatprep.subr.bf16.mxu1 %v3284_v38  ;;  %v3354_v36 = vld [vmem:[#allocation11 + $0x98] sm:$0xff]   ;;  %v3355_v37 = vld [vmem:[#allocation11 + $0x60] sm:$0xff]  }
 0x286   :  { %v3356_v38 = vld [vmem:[#allocation11 + $0xe0] sm:$0xff]  }
 0x288   :  { %2084 = vmatpush1.bf16.msra.mxu0 %v3279_v39  ;;  %2166 = vmatpush1.bf16.msra.mxu1 %v3282_v40  ;;  %v3357_v39 = vld [vmem:[#allocation11 + $0x20] sm:$0xff]  }
 0x289   :  { %2085 = vmatprep.subr.bf16.mxu0 %v3287_v14  ;;  %2167 = vmatprep.subr.bf16.mxu1 %v3290_v41  ;;  %v3358_v40 = vld [vmem:[#allocation11 + $0xa0] sm:$0xff]   ;;  %v3359_v14 = vld [vmem:[#allocation11 + $0x68] sm:$0xff]  }
 0x28a   :  { %v3360_v41 = vld [vmem:[#allocation11 + $0xe8] sm:$0xff]  }
 0x28c   :  { %2086 = vmatpush1.bf16.msra.mxu0 %v3285_v42  ;;  %2168 = vmatpush1.bf16.msra.mxu1 %v3288_v43  ;;  %v3361_v42 = vld [vmem:[#allocation11 + $0x28] sm:$0xff]  }
 0x28d   :  { %2087 = vmatprep.subr.bf16.mxu0 %v3293_v44  ;;  %2169 = vmatprep.subr.bf16.mxu1 %v3296_v45  ;;  %v3362_v43 = vld [vmem:[#allocation11 + $0xa8] sm:$0xff]   ;;  %v3363_v44 = vld [vmem:[#allocation11 + $0x70] sm:$0xff]  }
 0x28e   :  { %v3364_v45 = vld [vmem:[#allocation11 + $0xf0] sm:$0xff]  }
 0x290   :  { %2088 = vmatpush1.bf16.msra.mxu0 %v3291_v16  ;;  %2170 = vmatpush1.bf16.msra.mxu1 %v3294_v46  ;;  %v3365_v16 = vld [vmem:[#allocation11 + $0x30] sm:$0xff]  }
 0x291   :  { %2089 = vmatprep.subr.bf16.mxu0 %v3299_v47  ;;  %2171 = vmatprep.subr.bf16.mxu1 %v3302_v48  ;;  %v3366_v46 = vld [vmem:[#allocation11 + $0xb0] sm:$0xff]   ;;  %v3367_v47 = vld [vmem:[#allocation11 + $0x78] sm:$0xff]  }
 0x292   :  { %v3368_v48 = vld [vmem:[#allocation11 + $0xf8] sm:$0xff]  }
 0x294   :  { %2090 = vmatpush1.bf16.msra.mxu0 %v3297_v49  ;;  %2172 = vmatpush1.bf16.msra.mxu1 %v3300_v29  ;;  %v3369_v49 = vld [vmem:[#allocation11 + $0x38] sm:$0xff]  }
 0x295   :  { %2091 = vmatprep.subr.bf16.mxu0 %v3305_v50  ;;  %2173 = vmatprep.subr.bf16.mxu1 %v3308_v52  ;;  %v3370_v29 = vld [vmem:[#allocation11 + $0xb8] sm:$0xff]   ;;  %v1368_v50 = vld [vmem:[%s3749_s6] sm:$0xf] }
 0x296   :  { %v1373_v52 = vrot.slane %v1368_v50, %v3681_v15 }
 0x298   :  { %2092 = vmatpush1.bf16.msra.mxu0 %v3303_v53  ;;  %2174 = vmatpush1.bf16.msra.mxu1 %v3306_v54  ;;  %v1381_v53 = vrot.slane %v1368_v50, %v3700_v31  ;;  %v1377_v54 = vrot.slane %v1368_v50, %v3686_v17 }
 0x299   :  { %2093 = vmatprep.subr.bf16.mxu0 %v3311_v55  ;;  %2175 = vmatprep.subr.bf16.mxu1 %v3314_v57  ;;  %v1385_v55 = vrot.slane %v1368_v50, %v3691_v19 }
 0x29c   :  { %2094 = vmatpush1.bf16.msra.mxu0 %v3309_v58  ;;  %2176 = vmatpush1.bf16.msra.mxu1 %v3312_v59 }
 0x29d   :  { %2095 = vmatprep.subr.bf16.mxu0 %v3317_v60  ;;  %2177 = vmatprep.subr.bf16.mxu1 %v3320_v61 }
 0x2a0   :  { %2096 = vmatpush1.bf16.msra.mxu0 %v3315_v62  ;;  %2178 = vmatpush1.bf16.msra.mxu1 %v3318_v63 }
 0x2a1   :  { %2097 = vmatprep.subr.bf16.mxu0 %v3323_v0  ;;  %2179 = vmatprep.subr.bf16.mxu1 %v3326_v1 }
 0x2a4   :  { %2098 = vmatpush1.bf16.msra.mxu0 %v3321_v2  ;;  %2180 = vmatpush1.bf16.msra.mxu1 %v3324_v3 }
 0x2a5   :  { %2099 = vmatprep.subr.bf16.mxu0 %v3329_v5  ;;  %2181 = vmatprep.subr.bf16.mxu1 %v3332_v6 }
 0x2a8   :  { %2100 = vmatpush1.bf16.msra.mxu0 %v3327_v7  ;;  %2182 = vmatpush1.bf16.msra.mxu1 %v3330_v8 }
 0x2a9   :  { %2101 = vmatprep.subr.bf16.mxu0 %v3335_v10  ;;  %2183 = vmatprep.subr.bf16.mxu1 %v3338_v11  ;;  %v2830_v11 = vld [vmem:[%s3751_s8] ss:$0 sm:$0xff] }
 0x2ac   :  { %2102 = vmatpush1.bf16.msra.mxu0 %v3333_v12  ;;  %2184 = vmatpush1.bf16.msra.mxu1 %v3336_v13 }
 0x2ad   :  { %2863 = vmatprep.subr.bf16.mxu0 %v3339_v51  ;;  %2885 = vmatprep.subr.bf16.mxu1 %v3340_v20 }
 0x2af   :  { %2104 = vmatmul.mubr.bf16.vlgmr.msra.gmra.mrb[8].mxu0 %v1238_v23  ;;  %2186 = vmatmul.mubr.bf16.vlgmr.msra.gmra.mrb[8].mxu1 %v1238_v23 }
 0x2b0   :  { %2864 = vmatpush3.bf16.msra.mxu0 %v3341_v21  ;;  %2886 = vmatpush3.bf16.msra.mxu1 %v3342_v22 }
 0x2b1   :  { %2865 = vmatprep.subr.bf16.mxu0 %v3343_v56  ;;  %2887 = vmatprep.subr.bf16.mxu1 %v3344_v24 }
 0x2b4   :  { %2866 = vmatpush3.bf16.msra.mxu0 %v3345_v25  ;;  %2888 = vmatpush3.bf16.msra.mxu1 %v3346_v26 }
 0x2b5   :  { %2867 = vmatprep.subr.bf16.mxu0 %v3347_v27  ;;  %2889 = vmatprep.subr.bf16.mxu1 %v3348_v28 }
 0x2b8   :  { %2868 = vmatpush3.bf16.msra.mxu0 %v3349_v30  ;;  %2890 = vmatpush3.bf16.msra.mxu1 %v3350_v32 }
 0x2b9   :  { %2869 = vmatprep.subr.bf16.mxu0 %v3351_v33  ;;  %2891 = vmatprep.subr.bf16.mxu1 %v3352_v34 }
 0x2bc   :  { %2870 = vmatpush3.bf16.msra.mxu0 %v3353_v35  ;;  %2892 = vmatpush3.bf16.msra.mxu1 %v3354_v36 }
 0x2bd   :  { %2871 = vmatprep.subr.bf16.mxu0 %v3355_v37  ;;  %2893 = vmatprep.subr.bf16.mxu1 %v3356_v38 }
 0x2c0   :  { %2872 = vmatpush3.bf16.msra.mxu0 %v3357_v39  ;;  %2894 = vmatpush3.bf16.msra.mxu1 %v3358_v40 }
 0x2c1   :  { %2873 = vmatprep.subr.bf16.mxu0 %v3359_v14  ;;  %2895 = vmatprep.subr.bf16.mxu1 %v3360_v41 }
 0x2c4   :  { %2874 = vmatpush3.bf16.msra.mxu0 %v3361_v42  ;;  %2896 = vmatpush3.bf16.msra.mxu1 %v3362_v43 }
 0x2c5   :  { %2875 = vmatprep.subr.bf16.mxu0 %v3363_v44  ;;  %2897 = vmatprep.subr.bf16.mxu1 %v3364_v45 }
 0x2c8   :  { %2876 = vmatpush3.bf16.msra.mxu0 %v3365_v16  ;;  %2898 = vmatpush3.bf16.msra.mxu1 %v3366_v46 }
 0x2c9   :  { %2877 = vmatprep.subr.bf16.mxu0 %v3367_v47  ;;  %2899 = vmatprep.subr.bf16.mxu1 %v3368_v48 }
 0x2cc   :  { %2878 = vmatpush3.bf16.msra.mxu0 %v3369_v49  ;;  %2900 = vmatpush3.bf16.msra.mxu1 %v3370_v29 }
 0x382   :  { %v2105_v57 = vpop.f32.mrb[8].mxu0  ;;  %v2187_v58 = vpop.f32.mrb[8].mxu1 }
 0x383   :  { %v2911_v59 = vadd.f32 %v2105_v57, %v1373_v52  ;;  %v2913_v60 = vadd.f32 %v2187_v58, %v1381_v53  ;;  %v2107_v61 = vpop.f32.mrb[9].mxu0  ;;  %v2189_v62 = vpop.f32.mrb[9].mxu1 }
 0x384   :  { %v2912_v63 = vadd.f32 %v2107_v61, %v1377_v54  ;;  %v2914_v0 = vadd.f32 %v2189_v62, %v1385_v55  ;;  %v2109_v1 = vpop.f32.mrb[10].mxu0  ;;  %v2191_v2 = vpop.f32.mrb[10].mxu1 }
 0x385   :  { %v2194_v3 = vmax.f32 %v2911_v59, 0.0  ;;  %v2196_v4 = vmax.f32 %v2913_v60, 0.0  ;;  %v2110_v5 = vpop.f32.mrb[11].mxu0  ;;  %v2192_v15 = vpop.f32.mrb[11].mxu1 }
 0x386   :  { %v2195_v6 = vmax.f32 %v2912_v63, 0.0  ;;  %v2197_v31 = vmax.f32 %v2914_v0, 0.0 }
 0x387   :  { %v2198_v8 = vpack.c.bf16 %v2194_v3, %v2194_v3  ;;  %v2200_v19 = vpack.c.bf16 %v2196_v4, %v2196_v4 }
 0x388   :  { %v2199_v7 = vpack.c.bf16 %v2195_v6, %v2195_v6  ;;  %v2201_v17 = vpack.c.bf16 %v2197_v31, %v2197_v31 }
 0x38a   :  { %2497 = vmatprep.mubr.bf16.mxu0 %v2199_v7  ;;  %2537 = vmatprep.mubr.bf16.mxu1 %v2201_v17 }
 0x38b   :  { %2498 = vmatmul.mubr.bf16.vlgmr.msra.gmra.mrb[12].mxu0 %v2198_v8  ;;  %2538 = vmatmul.mubr.bf16.vlgmr.msra.gmra.mrb[12].mxu1 %v2200_v19 }
 0x45e   :  { %v2879_v9 = vpop.f32.mrb[12].mxu0  ;;  %v2901_v10 = vpop.f32.mrb[12].mxu1 }
 0x45f   :  { %v2880_v12 = vpop.f32.mrb[13].mxu0  ;;  %v2902_v13 = vpop.f32.mrb[13].mxu1 }
 0x460   :  { %v2881_v18 = vadd.f32 %v2880_v12, %v2879_v9  ;;  %v2903_v51 = vadd.f32 %v2902_v13, %v2901_v10  ;;  %v2882_v20 = vpop.f32.mrb[14].mxu0  ;;  %v2904_v21 = vpop.f32.mrb[14].mxu1 }
 0x461   :  { %v2883_v22 = vpop.f32.mrb[15].mxu0  ;;  %v2905_v23 = vpop.f32.mrb[15].mxu1 }
 0x462   :  { %v2500_v56 = vadd.f32 %v2881_v18, %v2830_v11 }
 0x464   :  { %v2540_v24 = vadd.f32 %v2903_v51, %v2500_v56 }
 0x466   :  { %2545 = vst [vmem:[#allocation13] sm:$0xff] %v2540_v24 }
 0x467   :  { %3514 = shalt.err (!%p3511_p10)
}
 0x468   :  { %s3515_s25 = scalar_lea.hbm %s3752_s9, 128 }
 0x469   :  { %p3516_p11 = scmp.ne.s32.totalorder %s3752_s9, %s3515_s25  ;;  %p3519_p12 = scmp.lt.u32.totalorder %s3515_s25, %s3752_s9 }
 0x46b   :  { %p3521_p13 = pnand %p3519_p12, %p3516_p11 }
 0x46d   :  { %3524 = shalt.err (!%p3521_p13)
}
 0x46e   :  { %2555 = dma.vmem_to_hbm [thread:$0]  %s2553_s21, 128, %s3752_s9, [#allocation4]  }
 0x46f   :  { %3533 = dma.done.wait [#allocation4], 128  }
 0x470   :  { %3534 = vsyncadd [#allocation4], 4294967168 }
 0x471   :  { %2559 = vsyncpa [#allocation3], 1 }
 0x472   :  { %2560 = vsyncpa [#allocation6], 1 }
 0x473   :  { %2561 = vsyncpa [#allocation9], 1 }
 0x474   :  { %2562 = vsyncpa [#allocation12], 1 }
 0x475   :  { %2563 = vsyncpa [#allocation4], 1 }

</bundles_post_ra>
